<compile_context>
chip_gen: v6e
topology: v6e:2x2x1
jax: 0.10.0
libtpu: 0.0.40
codegen_flags: <defaults>
</compile_context>

<pallas_src>
import functools
import math

import jax
import jax.numpy as jnp
import numpy as np
from jax.experimental import pallas as pl
from jax.experimental.pallas import tpu as pltpu

LRELU_SLOPE = 0.2
IN_EPS = 1e-5
SQRT2 = math.sqrt(2.0)


# =============================================================================
# Fused Pallas kernel
# =============================================================================
def _fused_kernel(*refs, layer_cfgs):
    """refs = (x_par, pre_style, <per-layer consts>, <mlp consts>, o_ref, <pad scratch>).

    layer_cfgs: static tuple of (Hin, Win, Cin, Cout, use_norm) per conv layer.
    """
    n_layers = len(layer_cfgs)
    n_scratch = n_layers - 1                       # layer 1 reads the pre-split input
    pad_refs = refs[len(refs) - n_scratch:]
    o_ref = refs[len(refs) - n_scratch - 1]
    in_refs = refs[:len(refs) - n_scratch - 1]

    it = iter(in_refs)
    x_ref = next(it)                               # (1, 2, H/2+1, (W+2)*C0) row-parity padded input
    pre_ref = next(it)                             # (1, 1, S)
    conv_refs = []
    for (_, _, _, _, use_norm) in layer_cfgs:
        if use_norm:
            conv_refs.append(tuple(next(it) for _ in range(4)))   # bigm, gamma_f, beta_f, avg
        else:
            conv_refs.append(tuple(next(it) for _ in range(2)))   # bigm, bias_f
    mlp_refs = tuple(it)                           # w0a, w0b, b0, w1, b1, w2, b2, w3, b3

    x = None                                       # current activation, folded (rows, W*C)
    for li, (hin, win, cin, cout, use_norm) in enumerate(layer_cfgs):
        ho, wo = hin // 2, win // 2

        # ---- row-parity padded representation of this layer's input ---------
        if li == 0:
            def rows(r, p0, _ref=x_ref, _ho=ho):
                return _ref[0, r, p0:p0 + _ho, :]
        else:
            pad_ref = pad_refs[li - 1]             # (2, ho+1, (win+2)*cin)
            pad_ref[...] = jnp.zeros(pad_ref.shape, pad_ref.dtype)
            wfold = win * cin
            for i in range(hin):                   # scatter prev-layer rows by parity
                r = (i + 1) % 2
                p = (i + 1) // 2
                pad_ref[r, p:p + 1, cin:cin + wfold] = x[i:i + 1, :]

            def rows(r, p0, _ref=pad_ref, _ho=ho):
                return _ref[r, p0:p0 + _ho, :]

        # ---- conv: 3 matmuls, one per kernel row (stride/pad/kx inside BigM) -
        bigm_ref = conv_refs[li][0]
        acc = jnp.dot(rows(0, 0), bigm_ref[0], preferred_element_type=jnp.float32)
        acc = acc + jnp.dot(rows(1, 0), bigm_ref[1], preferred_element_type=jnp.float32)
        acc = acc + jnp.dot(rows(0, 1), bigm_ref[2], preferred_element_type=jnp.float32)

        if use_norm:
            # InstanceNorm2d (biased var, eps inside rsqrt).  Conv bias omitted:
            # exactly cancelled by the per-channel mean subtraction.
            _, gamma_ref, beta_ref, avg_ref = conv_refs[li]
            s1 = jnp.sum(acc, axis=0, keepdims=True)
            s2 = jnp.sum(acc * acc, axis=0, keepdims=True)
            mean_f = jnp.dot(s1, avg_ref[...], preferred_element_type=jnp.float32)
            ex2_f = jnp.dot(s2, avg_ref[...], preferred_element_type=jnp.float32)
            var_f = ex2_f - mean_f * mean_f
            acc = (acc - mean_f) * (jax.lax.rsqrt(var_f + IN_EPS) * gamma_ref[...])
            acc = acc + beta_ref[...]
        else:
            acc = acc + conv_refs[li][1][...]      # conv bias (folded)

        x = jnp.where(acc >= 0.0, acc, LRELU_SLOPE * acc)      # LeakyReLU(0.2)

    # ---- x is now (1, style_dim): last conv layer has 1x1 spatial output ------
    h = x
    p = pre_ref[0]                                 # (1, S)
    w0a, w0b, b0 = mlp_refs[0], mlp_refs[1], mlp_refs[2]
    # EqualLinear on concat([conv_feat, pre_style]) == split-weight matmuls.
    h = (jnp.dot(h, w0a[...], preferred_element_type=jnp.float32)
         + jnp.dot(p, w0b[...], preferred_element_type=jnp.float32) + b0[...])
    h = jnp.where(h >= 0.0, h, LRELU_SLOPE * h) * SQRT2
    for k in range(3):
        w_r, b_r = mlp_refs[3 + 2 * k], mlp_refs[4 + 2 * k]
        h = jnp.dot(h, w_r[...], preferred_element_type=jnp.float32) + b_r[...]
        h = jnp.where(h >= 0.0, h, LRELU_SLOPE * h) * SQRT2
    o_ref[0] = h.astype(o_ref.dtype)


# =============================================================================
# Host-side constant construction (block-Toeplitz conv matrices, folded norms)
# =============================================================================
def _conv_layer_constants(w_hwio, gamma, beta, bias, hin, win, use_norm):
    kh, kw, cin, cout = w_hwio.shape
    assert (kh, kw) == (3, 3)
    ho, wo = hin // 2, win // 2
    wp = win + 2
    w_np = np.asarray(w_hwio, np.float32)
    bigm = np.zeros((3, wp * cin, wo * cout), np.float32)
    for ky in range(3):
        for j in range(wo):
            for kx in range(3):
                w_col = 2 * j + kx
                bigm[ky, w_col * cin:(w_col + 1) * cin,
                     j * cout:(j + 1) * cout] = w_np[ky, kx]
    out = {"bigm": jnp.asarray(bigm)}
    if use_norm:
        out["gamma_f"] = jnp.asarray(np.tile(np.asarray(gamma, np.float32), wo)[None, :])
        out["beta_f"] = jnp.asarray(np.tile(np.asarray(beta, np.float32), wo)[None, :])
        out["avg"] = jnp.asarray(
            np.tile(np.eye(cout, dtype=np.float32), (wo, wo)) / float(ho * wo))
    else:
        out["bias_f"] = jnp.asarray(np.tile(np.asarray(bias, np.float32), wo)[None, :])
    return out


def init_expression_fusion_params(key, in_ch, style_dim, spatial, expression_dim):
    block_size = int(math.log(spatial, 2))
    if block_size < 4:
        # TODO(synk): the spatial<16 path (extra stride-1 ConvBlocks with BatchNorm2d
        # cross-batch running statistics) is not implemented.
        raise NotImplementedError("spatial < 16 path (BatchNorm blocks) not implemented")

    # Static layer configuration: (Hin, Win, Cin, Cout, use_norm)
    layer_cfgs = []
    out_ch = in_ch
    cin = in_ch + expression_dim
    cur = spatial
    for _ in range(block_size):
        if out_ch != style_dim:
            out_ch = out_ch * 2
        hin = cur
        cur = cur // 2
        use_norm = cur != 1
        layer_cfgs.append((hin, hin, cin, out_ch, use_norm))
        cin = out_ch

    # Raw conv params (deterministic stand-in for the torch initialization).
    conv_raw = []
    for (hin, win, ci, co, use_norm) in layer_cfgs:
        key, kw_, kb_ = jax.random.split(key, 3)
        w = 0.05 * jax.random.normal(kw_, (3, 3, ci, co), jnp.float32)     # HWIO
        b = 0.01 * jax.random.normal(kb_, (co,), jnp.float32)
        gamma = jnp.ones((co,), jnp.float32)     # InstanceNorm2d affine defaults
        beta = jnp.zeros((co,), jnp.float32)
        conv_raw.append((w, b, gamma, beta))

    # EqualLinear stack [2S->S, S->S, S->S, S->S], lr_mul=0.01, fused_lrelu:
    # store pre-scaled (in, out) weights:  randn/lr_mul * (lr_mul/sqrt(in)).
    mlp_raw = []
    din = style_dim * 2
    for _ in range(4):
        key, kw_ = jax.random.split(key)
        w_scaled = jax.random.normal(kw_, (din, style_dim), jnp.float32) / math.sqrt(din)
        b_scaled = jnp.zeros((1, style_dim), jnp.float32)
        mlp_raw.append((w_scaled, b_scaled))
        din = style_dim

    conv_consts = []
    for cfg, (w, b, g, bt) in zip(layer_cfgs, conv_raw):
        hin, win, _, _, use_norm = cfg
        conv_consts.append(_conv_layer_constants(w, g, bt, b, hin, win, use_norm))

    params = {"conv": conv_consts, "mlp": mlp_raw, "raw_conv": conv_raw}
    return params, tuple(layer_cfgs)


# =============================================================================
# Forward wrapper (static config closed over -> no tracer-valued static params)
# =============================================================================
def make_expression_fusion_forward(layer_cfgs, style_dim):
    layer_cfgs = tuple(tuple(int(v) if not isinstance(v, bool) else v for v in c)
                       for c in layer_cfgs)

    def forward(params, img_nchw, exp, pre_style):
        B, C, H, W = img_nchw.shape
        c0 = C + exp.shape[1]

        # ---- XLA glue: NCHW->NHWC, expression broadcast+concat, fold W into
        #      lanes, zero-pad, split rows by parity.  Everything else is fused.
        x = jnp.transpose(img_nchw, (0, 2, 3, 1))
        e = jnp.broadcast_to(exp[:, None, None, :], (B, H, W, exp.shape[1]))
        x = jnp.concatenate([x, e], axis=-1)                     # (B,H,W,C0)
        xp = jnp.pad(x, ((0, 0), (1, 1), (1, 1), (0, 0)))        # (B,H+2,W+2,C0)
        xpar = jnp.stack([xp[:, 0::2], xp[:, 1::2]], axis=1)     # (B,2,H/2+1,W+2,C0)
        xpar = xpar.reshape(B, 2, H // 2 + 1, (W + 2) * c0)
        pre3 = pre_style.reshape(B, 1, style_dim)

        operands = [xpar, pre3]
        in_specs = [
            pl.BlockSpec((1,) + xpar.shape[1:], lambda b: (b, 0, 0, 0)),
            pl.BlockSpec((1, 1, style_dim), lambda b: (b, 0, 0)),
        ]

        def const_spec(a):
            return pl.BlockSpec(a.shape, lambda b, _nd=a.ndim: (0,) * _nd)

        for cfg, cc in zip(layer_cfgs, params["conv"]):
            if cfg[4]:
                arrs = [cc["bigm"], cc["gamma_f"], cc["beta_f"], cc["avg"]]
            else:
                arrs = [cc["bigm"], cc["bias_f"]]
            for a in arrs:
                operands.append(a)
                in_specs.append(const_spec(a))

        w0, b0 = params["mlp"][0]
        mlp_arrs = [w0[:style_dim], w0[style_dim:], b0]
        for (w_, b_) in params["mlp"][1:]:
            mlp_arrs += [w_, b_]
        for a in mlp_arrs:
            operands.append(a)
            in_specs.append(const_spec(a))

        scratch = [
            pltpu.VMEM((2, hin // 2 + 1, (win + 2) * cin), jnp.float32)
            for (hin, win, cin, _co, _n) in layer_cfgs[1:]
        ]

        kernel = functools.partial(_fused_kernel, layer_cfgs=layer_cfgs)
        out = pl.pallas_call(
            kernel,
            out_shape=jax.ShapeDtypeStruct((B, 1, style_dim), jnp.float32),
            grid=(B,),
            in_specs=in_specs,
            out_specs=pl.BlockSpec((1, 1, style_dim), lambda b: (b, 0, 0)),
            scratch_shapes=scratch,
            compiler_params=pltpu.CompilerParams(
                dimension_semantics=("parallel",)),
        )(*operands)
        return out.reshape(B, style_dim)

    return jax.jit(forward)


# =============================================================================
# Pure-JAX reference (for correctness check only)
# =============================================================================
def _reference_forward(params, layer_cfgs, img, exp, pre_style):
    B, C, H, W = img.shape
    x = jnp.transpose(img, (0, 2, 3, 1))
    e = jnp.broadcast_to(exp[:, None, None, :], (B, H, W, exp.shape[1]))
    x = jnp.concatenate([x, e], axis=-1)
    for cfg, (w, b, g, bt) in zip(layer_cfgs, params["raw_conv"]):
        use_norm = cfg[4]
        x = jax.lax.conv_general_dilated(
            x, w, window_strides=(2, 2), padding=((1, 1), (1, 1)),
            dimension_numbers=("NHWC", "HWIO", "NHWC"),
            precision=jax.lax.Precision.HIGHEST)
        x = x + b[None, None, None, :]
        if use_norm:
            mean = jnp.mean(x, axis=(1, 2), keepdims=True)
            var = jnp.mean((x - mean) ** 2, axis=(1, 2), keepdims=True)
            x = (x - mean) * jax.lax.rsqrt(var + IN_EPS)
            x = x * g[None, None, None, :] + bt[None, None, None, :]
        x = jnp.where(x >= 0.0, x, LRELU_SLOPE * x)
    h = x.reshape(B, -1)
    h = jnp.concatenate([h, pre_style], axis=1)
    for (w_, b_) in params["mlp"]:
        h = jnp.dot(h, w_, precision=jax.lax.Precision.HIGHEST) + b_
        h = jnp.where(h >= 0.0, h, LRELU_SLOPE * h) * SQRT2
    return h


if __name__ == "__main__":
    B, in_ch, spatial = 2, 4, 16
    expression_dim, style_dim = 4, 32

    key = jax.random.PRNGKey(0)
    kp, k1, k2, k3 = jax.random.split(key, 4)
    params, layer_cfgs = init_expression_fusion_params(
        kp, in_ch, style_dim, spatial, expression_dim)

    img = jax.random.normal(k1, (B, in_ch, spatial, spatial), jnp.float32)  # NCHW like torch
    exp = jax.random.normal(k2, (B, expression_dim), jnp.float32)
    pre_style = jax.random.normal(k3, (B, style_dim), jnp.float32)

    forward = make_expression_fusion_forward(layer_cfgs, style_dim)
    out = forward(params, img, exp, pre_style)
    out = jax.block_until_ready(out)

    assert out.shape == (B, style_dim), out.shape
    assert bool(jnp.all(jnp.isfinite(out)))

    ref = _reference_forward(params, layer_cfgs, img, exp, pre_style)
    assert bool(jnp.allclose(out, ref, atol=2e-2, rtol=2e-2)), \
        float(jnp.max(jnp.abs(out - ref)))

    print("KERNEL_OK")
</pallas_src>

<mosaic_0001>
module attributes {stable_mosaic.version = 11 : i64} {
  func.func @_fused_kernel(%arg0: i32, %arg1: memref<1x2x9x144xf32, #tpu.memory_space<vmem>>, %arg2: memref<1x1x32xf32, #tpu.memory_space<vmem>>, %arg3: memref<3x144x64xf32, #tpu.memory_space<vmem>>, %arg4: memref<1x64xf32, #tpu.memory_space<vmem>>, %arg5: memref<1x64xf32, #tpu.memory_space<vmem>>, %arg6: memref<64x64xf32, #tpu.memory_space<vmem>>, %arg7: memref<3x80x64xf32, #tpu.memory_space<vmem>>, %arg8: memref<1x64xf32, #tpu.memory_space<vmem>>, %arg9: memref<1x64xf32, #tpu.memory_space<vmem>>, %arg10: memref<64x64xf32, #tpu.memory_space<vmem>>, %arg11: memref<3x96x64xf32, #tpu.memory_space<vmem>>, %arg12: memref<1x64xf32, #tpu.memory_space<vmem>>, %arg13: memref<1x64xf32, #tpu.memory_space<vmem>>, %arg14: memref<64x64xf32, #tpu.memory_space<vmem>>, %arg15: memref<3x128x32xf32, #tpu.memory_space<vmem>>, %arg16: memref<1x32xf32, #tpu.memory_space<vmem>>, %arg17: memref<32x32xf32, #tpu.memory_space<vmem>>, %arg18: memref<32x32xf32, #tpu.memory_space<vmem>>, %arg19: memref<1x32xf32, #tpu.memory_space<vmem>>, %arg20: memref<32x32xf32, #tpu.memory_space<vmem>>, %arg21: memref<1x32xf32, #tpu.memory_space<vmem>>, %arg22: memref<32x32xf32, #tpu.memory_space<vmem>>, %arg23: memref<1x32xf32, #tpu.memory_space<vmem>>, %arg24: memref<32x32xf32, #tpu.memory_space<vmem>>, %arg25: memref<1x32xf32, #tpu.memory_space<vmem>>, %arg26: memref<1x1x32xf32, #tpu.memory_space<vmem>>, %arg27: memref<2x5x80xf32, #tpu.memory_space<vmem>>, %arg28: memref<2x3x96xf32, #tpu.memory_space<vmem>>, %arg29: memref<2x2x128xf32, #tpu.memory_space<vmem>>) attributes {dimension_semantics = [#tpu.dimension_semantics<parallel>], iteration_bounds = array<i64: 2>, scalar_prefetch = 0 : i64, scratch_operands = 3 : i64, tpu.core_type = #tpu.core_type<tc>, window_params = [{transform_indices = @transform_0, window_bounds = array<i64: 1, 2, 9, 144>}, {transform_indices = @transform_1, window_bounds = array<i64: 1, 1, 32>}, {pipeline_mode = #tpu.pipeline_mode<synchronous>, transform_indices = @transform_2, window_bounds = array<i64: 3, 144, 64>}, {pipeline_mode = #tpu.pipeline_mode<synchronous>, transform_indices = @transform_3, window_bounds = array<i64: 1, 64>}, {pipeline_mode = #tpu.pipeline_mode<synchronous>, transform_indices = @transform_4, window_bounds = array<i64: 1, 64>}, {pipeline_mode = #tpu.pipeline_mode<synchronous>, transform_indices = @transform_5, window_bounds = array<i64: 64, 64>}, {pipeline_mode = #tpu.pipeline_mode<synchronous>, transform_indices = @transform_6, window_bounds = array<i64: 3, 80, 64>}, {pipeline_mode = #tpu.pipeline_mode<synchronous>, transform_indices = @transform_7, window_bounds = array<i64: 1, 64>}, {pipeline_mode = #tpu.pipeline_mode<synchronous>, transform_indices = @transform_8, window_bounds = array<i64: 1, 64>}, {pipeline_mode = #tpu.pipeline_mode<synchronous>, transform_indices = @transform_9, window_bounds = array<i64: 64, 64>}, {pipeline_mode = #tpu.pipeline_mode<synchronous>, transform_indices = @transform_10, window_bounds = array<i64: 3, 96, 64>}, {pipeline_mode = #tpu.pipeline_mode<synchronous>, transform_indices = @transform_11, window_bounds = array<i64: 1, 64>}, {pipeline_mode = #tpu.pipeline_mode<synchronous>, transform_indices = @transform_12, window_bounds = array<i64: 1, 64>}, {pipeline_mode = #tpu.pipeline_mode<synchronous>, transform_indices = @transform_13, window_bounds = array<i64: 64, 64>}, {pipeline_mode = #tpu.pipeline_mode<synchronous>, transform_indices = @transform_14, window_bounds = array<i64: 3, 128, 32>}, {pipeline_mode = #tpu.pipeline_mode<synchronous>, transform_indices = @transform_15, window_bounds = array<i64: 1, 32>}, {pipeline_mode = #tpu.pipeline_mode<synchronous>, transform_indices = @transform_16, window_bounds = array<i64: 32, 32>}, {pipeline_mode = #tpu.pipeline_mode<synchronous>, transform_indices = @transform_17, window_bounds = array<i64: 32, 32>}, {pipeline_mode = #tpu.pipeline_mode<synchronous>, transform_indices = @transform_18, window_bounds = array<i64: 1, 32>}, {pipeline_mode = #tpu.pipeline_mode<synchronous>, transform_indices = @transform_19, window_bounds = array<i64: 32, 32>}, {pipeline_mode = #tpu.pipeline_mode<synchronous>, transform_indices = @transform_20, window_bounds = array<i64: 1, 32>}, {pipeline_mode = #tpu.pipeline_mode<synchronous>, transform_indices = @transform_21, window_bounds = array<i64: 32, 32>}, {pipeline_mode = #tpu.pipeline_mode<synchronous>, transform_indices = @transform_22, window_bounds = array<i64: 1, 32>}, {pipeline_mode = #tpu.pipeline_mode<synchronous>, transform_indices = @transform_23, window_bounds = array<i64: 32, 32>}, {pipeline_mode = #tpu.pipeline_mode<synchronous>, transform_indices = @transform_24, window_bounds = array<i64: 1, 32>}, {transform_indices = @transform_25, window_bounds = array<i64: 1, 1, 32>}]} {
    %c0 = arith.constant 0 : index
    %c0_0 = arith.constant 0 : index
    %c0_1 = arith.constant 0 : index
    %c0_2 = arith.constant 0 : index
    %0 = vector.load %arg1[%c0, %c0_0, %c0_1, %c0_2] : memref<1x2x9x144xf32, #tpu.memory_space<vmem>>, vector<1x1x8x144xf32>
    %1 = vector.shape_cast %0 : vector<1x1x8x144xf32> to vector<8x144xf32>
    %c0_3 = arith.constant 0 : index
    %c0_4 = arith.constant 0 : index
    %c0_5 = arith.constant 0 : index
    %2 = vector.load %arg3[%c0_3, %c0_4, %c0_5] : memref<3x144x64xf32, #tpu.memory_space<vmem>>, vector<1x144x64xf32>
    %3 = vector.shape_cast %2 : vector<1x144x64xf32> to vector<144x64xf32>
    %cst = arith.constant dense<0.000000e+00> : vector<8x64xf32>
    %4 = tpu.matmul %1, %3, %cst {dimension_numbers = #tpu.dot_dimension_numbers<[1], [0], [0], [1], [0, 0, 1, 1], [], []>} : vector<8x144xf32>, vector<144x64xf32>, vector<8x64xf32> -> vector<8x64xf32>
    %c0_6 = arith.constant 0 : index
    %c1 = arith.constant 1 : index
    %c0_7 = arith.constant 0 : index
    %c0_8 = arith.constant 0 : index
    %5 = vector.load %arg1[%c0_6, %c1, %c0_7, %c0_8] : memref<1x2x9x144xf32, #tpu.memory_space<vmem>>, vector<1x1x8x144xf32>
    %6 = vector.shape_cast %5 : vector<1x1x8x144xf32> to vector<8x144xf32>
    %c1_9 = arith.constant 1 : index
    %c0_10 = arith.constant 0 : index
    %c0_11 = arith.constant 0 : index
    %7 = vector.load %arg3[%c1_9, %c0_10, %c0_11] : memref<3x144x64xf32, #tpu.memory_space<vmem>>, vector<1x144x64xf32>
    %8 = vector.shape_cast %7 : vector<1x144x64xf32> to vector<144x64xf32>
    %cst_12 = arith.constant dense<0.000000e+00> : vector<8x64xf32>
    %9 = tpu.matmul %6, %8, %cst_12 {dimension_numbers = #tpu.dot_dimension_numbers<[1], [0], [0], [1], [0, 0, 1, 1], [], []>} : vector<8x144xf32>, vector<144x64xf32>, vector<8x64xf32> -> vector<8x64xf32>
    %10 = arith.addf %4, %9 : vector<8x64xf32>
    %c0_13 = arith.constant 0 : index
    %c0_14 = arith.constant 0 : index
    %c1_15 = arith.constant 1 : index
    %c0_16 = arith.constant 0 : index
    %11 = vector.load %arg1[%c0_13, %c0_14, %c1_15, %c0_16] : memref<1x2x9x144xf32, #tpu.memory_space<vmem>>, vector<1x1x8x144xf32>
    %12 = vector.shape_cast %11 : vector<1x1x8x144xf32> to vector<8x144xf32>
    %c2 = arith.constant 2 : index
    %c0_17 = arith.constant 0 : index
    %c0_18 = arith.constant 0 : index
    %13 = vector.load %arg3[%c2, %c0_17, %c0_18] : memref<3x144x64xf32, #tpu.memory_space<vmem>>, vector<1x144x64xf32>
    %14 = vector.shape_cast %13 : vector<1x144x64xf32> to vector<144x64xf32>
    %cst_19 = arith.constant dense<0.000000e+00> : vector<8x64xf32>
    %15 = tpu.matmul %12, %14, %cst_19 {dimension_numbers = #tpu.dot_dimension_numbers<[1], [0], [0], [1], [0, 0, 1, 1], [], []>} : vector<8x144xf32>, vector<144x64xf32>, vector<8x64xf32> -> vector<8x64xf32>
    %16 = arith.addf %10, %15 : vector<8x64xf32>
    %cst_20 = arith.constant dense<0.000000e+00> : vector<64xf32>
    %17 = vector.multi_reduction <add>, %16, %cst_20 [0] : vector<8x64xf32> to vector<64xf32>
    %18 = vector.shape_cast %17 : vector<64xf32> to vector<1x64xf32>
    %19 = arith.mulf %16, %16 : vector<8x64xf32>
    %cst_21 = arith.constant dense<0.000000e+00> : vector<64xf32>
    %20 = vector.multi_reduction <add>, %19, %cst_21 [0] : vector<8x64xf32> to vector<64xf32>
    %21 = vector.shape_cast %20 : vector<64xf32> to vector<1x64xf32>
    %c0_22 = arith.constant 0 : index
    %c0_23 = arith.constant 0 : index
    %22 = vector.load %arg6[%c0_22, %c0_23] : memref<64x64xf32, #tpu.memory_space<vmem>>, vector<64x64xf32>
    %cst_24 = arith.constant dense<0.000000e+00> : vector<1x64xf32>
    %23 = tpu.matmul %18, %22, %cst_24 {dimension_numbers = #tpu.dot_dimension_numbers<[1], [0], [0], [1], [0, 0, 1, 1], [], []>} : vector<1x64xf32>, vector<64x64xf32>, vector<1x64xf32> -> vector<1x64xf32>
    %c0_25 = arith.constant 0 : index
    %c0_26 = arith.constant 0 : index
    %24 = vector.load %arg6[%c0_25, %c0_26] : memref<64x64xf32, #tpu.memory_space<vmem>>, vector<64x64xf32>
    %cst_27 = arith.constant dense<0.000000e+00> : vector<1x64xf32>
    %25 = tpu.matmul %21, %24, %cst_27 {dimension_numbers = #tpu.dot_dimension_numbers<[1], [0], [0], [1], [0, 0, 1, 1], [], []>} : vector<1x64xf32>, vector<64x64xf32>, vector<1x64xf32> -> vector<1x64xf32>
    %26 = arith.mulf %23, %23 : vector<1x64xf32>
    %27 = arith.subf %25, %26 : vector<1x64xf32>
    %28 = vector.broadcast %23 : vector<1x64xf32> to vector<8x64xf32>
    %29 = arith.subf %16, %28 : vector<8x64xf32>
    %cst_28 = arith.constant 9.99999974E-6 : f32
    %30 = vector.broadcast %cst_28 : f32 to vector<1x64xf32>
    %31 = arith.addf %27, %30 : vector<1x64xf32>
    %32 = math.rsqrt %31 : vector<1x64xf32>
    %c0_29 = arith.constant 0 : index
    %c0_30 = arith.constant 0 : index
    %33 = vector.load %arg4[%c0_29, %c0_30] : memref<1x64xf32, #tpu.memory_space<vmem>>, vector<1x64xf32>
    %34 = arith.mulf %32, %33 : vector<1x64xf32>
    %35 = vector.broadcast %34 : vector<1x64xf32> to vector<8x64xf32>
    %36 = arith.mulf %29, %35 : vector<8x64xf32>
    %c0_31 = arith.constant 0 : index
    %c0_32 = arith.constant 0 : index
    %37 = vector.load %arg5[%c0_31, %c0_32] : memref<1x64xf32, #tpu.memory_space<vmem>>, vector<1x64xf32>
    %38 = vector.broadcast %37 : vector<1x64xf32> to vector<8x64xf32>
    %39 = arith.addf %36, %38 : vector<8x64xf32>
    %cst_33 = arith.constant 0.000000e+00 : f32
    %40 = vector.broadcast %cst_33 : f32 to vector<8x64xf32>
    %41 = arith.cmpf oge, %39, %40 : vector<8x64xf32>
    %cst_34 = arith.constant 2.000000e-01 : f32
    %42 = vector.broadcast %cst_34 : f32 to vector<8x64xf32>
    %43 = arith.mulf %42, %39 : vector<8x64xf32>
    %44 = arith.select %41, %39, %43 : vector<8x64xi1>, vector<8x64xf32>
    %cst_35 = arith.constant 0.000000e+00 : f32
    %45 = vector.broadcast %cst_35 : f32 to vector<2x5x80xf32>
    %c0_36 = arith.constant 0 : index
    %c0_37 = arith.constant 0 : index
    %c0_38 = arith.constant 0 : index
    %46 = vector.load %arg27[%c0_36, %c0_37, %c0_38] : memref<2x5x80xf32, #tpu.memory_space<vmem>>, vector<2x5x80xf32>
    tpu.vector_store %arg27[%c0_36, %c0_37, %c0_38], %45 {strides = array<i32>} : memref<2x5x80xf32, #tpu.memory_space<vmem>>, vector<2x5x80xf32>,
    %47 = vector.extract_strided_slice %44 {offsets = [0, 0], sizes = [1, 64], strides = [1, 1]} : vector<8x64xf32> to vector<1x64xf32>
    %c1_39 = arith.constant 1 : index
    %c0_40 = arith.constant 0 : index
    %c8 = arith.constant 8 : index
    %48 = vector.load %arg27[%c1_39, %c0_40, %c8] : memref<2x5x80xf32, #tpu.memory_space<vmem>>, vector<1x1x64xf32>
    %49 = vector.shape_cast %48 : vector<1x1x64xf32> to vector<1x64xf32>
    %50 = vector.shape_cast %47 : vector<1x64xf32> to vector<1x1x64xf32>
    tpu.vector_store %arg27[%c1_39, %c0_40, %c8], %50 {strides = array<i32>} : memref<2x5x80xf32, #tpu.memory_space<vmem>>, vector<1x1x64xf32>,
    %51 = vector.extract_strided_slice %44 {offsets = [1, 0], sizes = [1, 64], strides = [1, 1]} : vector<8x64xf32> to vector<1x64xf32>
    %c0_41 = arith.constant 0 : index
    %c1_42 = arith.constant 1 : index
    %c8_43 = arith.constant 8 : index
    %52 = vector.load %arg27[%c0_41, %c1_42, %c8_43] : memref<2x5x80xf32, #tpu.memory_space<vmem>>, vector<1x1x64xf32>
    %53 = vector.shape_cast %52 : vector<1x1x64xf32> to vector<1x64xf32>
    %54 = vector.shape_cast %51 : vector<1x64xf32> to vector<1x1x64xf32>
    tpu.vector_store %arg27[%c0_41, %c1_42, %c8_43], %54 {strides = array<i32>} : memref<2x5x80xf32, #tpu.memory_space<vmem>>, vector<1x1x64xf32>,
    %55 = vector.extract_strided_slice %44 {offsets = [2, 0], sizes = [1, 64], strides = [1, 1]} : vector<8x64xf32> to vector<1x64xf32>
    %c1_44 = arith.constant 1 : index
    %c1_45 = arith.constant 1 : index
    %c8_46 = arith.constant 8 : index
    %56 = vector.load %arg27[%c1_44, %c1_45, %c8_46] : memref<2x5x80xf32, #tpu.memory_space<vmem>>, vector<1x1x64xf32>
    %57 = vector.shape_cast %56 : vector<1x1x64xf32> to vector<1x64xf32>
    %58 = vector.shape_cast %55 : vector<1x64xf32> to vector<1x1x64xf32>
    tpu.vector_store %arg27[%c1_44, %c1_45, %c8_46], %58 {strides = array<i32>} : memref<2x5x80xf32, #tpu.memory_space<vmem>>, vector<1x1x64xf32>,
    %59 = vector.extract_strided_slice %44 {offsets = [3, 0], sizes = [1, 64], strides = [1, 1]} : vector<8x64xf32> to vector<1x64xf32>
    %c0_47 = arith.constant 0 : index
    %c2_48 = arith.constant 2 : index
    %c8_49 = arith.constant 8 : index
    %60 = vector.load %arg27[%c0_47, %c2_48, %c8_49] : memref<2x5x80xf32, #tpu.memory_space<vmem>>, vector<1x1x64xf32>
    %61 = vector.shape_cast %60 : vector<1x1x64xf32> to vector<1x64xf32>
    %62 = vector.shape_cast %59 : vector<1x64xf32> to vector<1x1x64xf32>
    tpu.vector_store %arg27[%c0_47, %c2_48, %c8_49], %62 {strides = array<i32>} : memref<2x5x80xf32, #tpu.memory_space<vmem>>, vector<1x1x64xf32>,
    %63 = vector.extract_strided_slice %44 {offsets = [4, 0], sizes = [1, 64], strides = [1, 1]} : vector<8x64xf32> to vector<1x64xf32>
    %c1_50 = arith.constant 1 : index
    %c2_51 = arith.constant 2 : index
    %c8_52 = arith.constant 8 : index
    %64 = vector.load %arg27[%c1_50, %c2_51, %c8_52] : memref<2x5x80xf32, #tpu.memory_space<vmem>>, vector<1x1x64xf32>
    %65 = vector.shape_cast %64 : vector<1x1x64xf32> to vector<1x64xf32>
    %66 = vector.shape_cast %63 : vector<1x64xf32> to vector<1x1x64xf32>
    tpu.vector_store %arg27[%c1_50, %c2_51, %c8_52], %66 {strides = array<i32>} : memref<2x5x80xf32, #tpu.memory_space<vmem>>, vector<1x1x64xf32>,
    %67 = vector.extract_strided_slice %44 {offsets = [5, 0], sizes = [1, 64], strides = [1, 1]} : vector<8x64xf32> to vector<1x64xf32>
    %c0_53 = arith.constant 0 : index
    %c3 = arith.constant 3 : index
    %c8_54 = arith.constant 8 : index
    %68 = vector.load %arg27[%c0_53, %c3, %c8_54] : memref<2x5x80xf32, #tpu.memory_space<vmem>>, vector<1x1x64xf32>
    %69 = vector.shape_cast %68 : vector<1x1x64xf32> to vector<1x64xf32>
    %70 = vector.shape_cast %67 : vector<1x64xf32> to vector<1x1x64xf32>
    tpu.vector_store %arg27[%c0_53, %c3, %c8_54], %70 {strides = array<i32>} : memref<2x5x80xf32, #tpu.memory_space<vmem>>, vector<1x1x64xf32>,
    %71 = vector.extract_strided_slice %44 {offsets = [6, 0], sizes = [1, 64], strides = [1, 1]} : vector<8x64xf32> to vector<1x64xf32>
    %c1_55 = arith.constant 1 : index
    %c3_56 = arith.constant 3 : index
    %c8_57 = arith.constant 8 : index
    %72 = vector.load %arg27[%c1_55, %c3_56, %c8_57] : memref<2x5x80xf32, #tpu.memory_space<vmem>>, vector<1x1x64xf32>
    %73 = vector.shape_cast %72 : vector<1x1x64xf32> to vector<1x64xf32>
    %74 = vector.shape_cast %71 : vector<1x64xf32> to vector<1x1x64xf32>
    tpu.vector_store %arg27[%c1_55, %c3_56, %c8_57], %74 {strides = array<i32>} : memref<2x5x80xf32, #tpu.memory_space<vmem>>, vector<1x1x64xf32>,
    %75 = vector.extract_strided_slice %44 {offsets = [7, 0], sizes = [1, 64], strides = [1, 1]} : vector<8x64xf32> to vector<1x64xf32>
    %c0_58 = arith.constant 0 : index
    %c4 = arith.constant 4 : index
    %c8_59 = arith.constant 8 : index
    %76 = vector.load %arg27[%c0_58, %c4, %c8_59] : memref<2x5x80xf32, #tpu.memory_space<vmem>>, vector<1x1x64xf32>
    %77 = vector.shape_cast %76 : vector<1x1x64xf32> to vector<1x64xf32>
    %78 = vector.shape_cast %75 : vector<1x64xf32> to vector<1x1x64xf32>
    tpu.vector_store %arg27[%c0_58, %c4, %c8_59], %78 {strides = array<i32>} : memref<2x5x80xf32, #tpu.memory_space<vmem>>, vector<1x1x64xf32>,
    %c0_60 = arith.constant 0 : index
    %c0_61 = arith.constant 0 : index
    %c0_62 = arith.constant 0 : index
    %79 = vector.load %arg27[%c0_60, %c0_61, %c0_62] : memref<2x5x80xf32, #tpu.memory_space<vmem>>, vector<1x4x80xf32>
    %80 = vector.shape_cast %79 : vector<1x4x80xf32> to vector<4x80xf32>
    %c0_63 = arith.constant 0 : index
    %c0_64 = arith.constant 0 : index
    %c0_65 = arith.constant 0 : index
    %81 = vector.load %arg7[%c0_63, %c0_64, %c0_65] : memref<3x80x64xf32, #tpu.memory_space<vmem>>, vector<1x80x64xf32>
    %82 = vector.shape_cast %81 : vector<1x80x64xf32> to vector<80x64xf32>
    %cst_66 = arith.constant dense<0.000000e+00> : vector<4x64xf32>
    %83 = tpu.matmul %80, %82, %cst_66 {dimension_numbers = #tpu.dot_dimension_numbers<[1], [0], [0], [1], [0, 0, 1, 1], [], []>} : vector<4x80xf32>, vector<80x64xf32>, vector<4x64xf32> -> vector<4x64xf32>
    %c1_67 = arith.constant 1 : index
    %c0_68 = arith.constant 0 : index
    %c0_69 = arith.constant 0 : index
    %84 = vector.load %arg27[%c1_67, %c0_68, %c0_69] : memref<2x5x80xf32, #tpu.memory_space<vmem>>, vector<1x4x80xf32>
    %85 = vector.shape_cast %84 : vector<1x4x80xf32> to vector<4x80xf32>
    %c1_70 = arith.constant 1 : index
    %c0_71 = arith.constant 0 : index
    %c0_72 = arith.constant 0 : index
    %86 = vector.load %arg7[%c1_70, %c0_71, %c0_72] : memref<3x80x64xf32, #tpu.memory_space<vmem>>, vector<1x80x64xf32>
    %87 = vector.shape_cast %86 : vector<1x80x64xf32> to vector<80x64xf32>
    %cst_73 = arith.constant dense<0.000000e+00> : vector<4x64xf32>
    %88 = tpu.matmul %85, %87, %cst_73 {dimension_numbers = #tpu.dot_dimension_numbers<[1], [0], [0], [1], [0, 0, 1, 1], [], []>} : vector<4x80xf32>, vector<80x64xf32>, vector<4x64xf32> -> vector<4x64xf32>
    %89 = arith.addf %83, %88 : vector<4x64xf32>
    %c0_74 = arith.constant 0 : index
    %c1_75 = arith.constant 1 : index
    %c0_76 = arith.constant 0 : index
    %90 = vector.load %arg27[%c0_74, %c1_75, %c0_76] : memref<2x5x80xf32, #tpu.memory_space<vmem>>, vector<1x4x80xf32>
    %91 = vector.shape_cast %90 : vector<1x4x80xf32> to vector<4x80xf32>
    %c2_77 = arith.constant 2 : index
    %c0_78 = arith.constant 0 : index
    %c0_79 = arith.constant 0 : index
    %92 = vector.load %arg7[%c2_77, %c0_78, %c0_79] : memref<3x80x64xf32, #tpu.memory_space<vmem>>, vector<1x80x64xf32>
    %93 = vector.shape_cast %92 : vector<1x80x64xf32> to vector<80x64xf32>
    %cst_80 = arith.constant dense<0.000000e+00> : vector<4x64xf32>
    %94 = tpu.matmul %91, %93, %cst_80 {dimension_numbers = #tpu.dot_dimension_numbers<[1], [0], [0], [1], [0, 0, 1, 1], [], []>} : vector<4x80xf32>, vector<80x64xf32>, vector<4x64xf32> -> vector<4x64xf32>
    %95 = arith.addf %89, %94 : vector<4x64xf32>
    %cst_81 = arith.constant dense<0.000000e+00> : vector<64xf32>
    %96 = vector.multi_reduction <add>, %95, %cst_81 [0] : vector<4x64xf32> to vector<64xf32>
    %97 = vector.shape_cast %96 : vector<64xf32> to vector<1x64xf32>
    %98 = arith.mulf %95, %95 : vector<4x64xf32>
    %cst_82 = arith.constant dense<0.000000e+00> : vector<64xf32>
    %99 = vector.multi_reduction <add>, %98, %cst_82 [0] : vector<4x64xf32> to vector<64xf32>
    %100 = vector.shape_cast %99 : vector<64xf32> to vector<1x64xf32>
    %c0_83 = arith.constant 0 : index
    %c0_84 = arith.constant 0 : index
    %101 = vector.load %arg10[%c0_83, %c0_84] : memref<64x64xf32, #tpu.memory_space<vmem>>, vector<64x64xf32>
    %cst_85 = arith.constant dense<0.000000e+00> : vector<1x64xf32>
    %102 = tpu.matmul %97, %101, %cst_85 {dimension_numbers = #tpu.dot_dimension_numbers<[1], [0], [0], [1], [0, 0, 1, 1], [], []>} : vector<1x64xf32>, vector<64x64xf32>, vector<1x64xf32> -> vector<1x64xf32>
    %c0_86 = arith.constant 0 : index
    %c0_87 = arith.constant 0 : index
    %103 = vector.load %arg10[%c0_86, %c0_87] : memref<64x64xf32, #tpu.memory_space<vmem>>, vector<64x64xf32>
    %cst_88 = arith.constant dense<0.000000e+00> : vector<1x64xf32>
    %104 = tpu.matmul %100, %103, %cst_88 {dimension_numbers = #tpu.dot_dimension_numbers<[1], [0], [0], [1], [0, 0, 1, 1], [], []>} : vector<1x64xf32>, vector<64x64xf32>, vector<1x64xf32> -> vector<1x64xf32>
    %105 = arith.mulf %102, %102 : vector<1x64xf32>
    %106 = arith.subf %104, %105 : vector<1x64xf32>
    %107 = vector.broadcast %102 : vector<1x64xf32> to vector<4x64xf32>
    %108 = arith.subf %95, %107 : vector<4x64xf32>
    %cst_89 = arith.constant 9.99999974E-6 : f32
    %109 = vector.broadcast %cst_89 : f32 to vector<1x64xf32>
    %110 = arith.addf %106, %109 : vector<1x64xf32>
    %111 = math.rsqrt %110 : vector<1x64xf32>
    %c0_90 = arith.constant 0 : index
    %c0_91 = arith.constant 0 : index
    %112 = vector.load %arg8[%c0_90, %c0_91] : memref<1x64xf32, #tpu.memory_space<vmem>>, vector<1x64xf32>
    %113 = arith.mulf %111, %112 : vector<1x64xf32>
    %114 = vector.broadcast %113 : vector<1x64xf32> to vector<4x64xf32>
    %115 = arith.mulf %108, %114 : vector<4x64xf32>
    %c0_92 = arith.constant 0 : index
    %c0_93 = arith.constant 0 : index
    %116 = vector.load %arg9[%c0_92, %c0_93] : memref<1x64xf32, #tpu.memory_space<vmem>>, vector<1x64xf32>
    %117 = vector.broadcast %116 : vector<1x64xf32> to vector<4x64xf32>
    %118 = arith.addf %115, %117 : vector<4x64xf32>
    %cst_94 = arith.constant 0.000000e+00 : f32
    %119 = vector.broadcast %cst_94 : f32 to vector<4x64xf32>
    %120 = arith.cmpf oge, %118, %119 : vector<4x64xf32>
    %cst_95 = arith.constant 2.000000e-01 : f32
    %121 = vector.broadcast %cst_95 : f32 to vector<4x64xf32>
    %122 = arith.mulf %121, %118 : vector<4x64xf32>
    %123 = arith.select %120, %118, %122 : vector<4x64xi1>, vector<4x64xf32>
    %cst_96 = arith.constant 0.000000e+00 : f32
    %124 = vector.broadcast %cst_96 : f32 to vector<2x3x96xf32>
    %c0_97 = arith.constant 0 : index
    %c0_98 = arith.constant 0 : index
    %c0_99 = arith.constant 0 : index
    %125 = vector.load %arg28[%c0_97, %c0_98, %c0_99] : memref<2x3x96xf32, #tpu.memory_space<vmem>>, vector<2x3x96xf32>
    tpu.vector_store %arg28[%c0_97, %c0_98, %c0_99], %124 {strides = array<i32>} : memref<2x3x96xf32, #tpu.memory_space<vmem>>, vector<2x3x96xf32>,
    %126 = vector.extract_strided_slice %123 {offsets = [0, 0], sizes = [1, 64], strides = [1, 1]} : vector<4x64xf32> to vector<1x64xf32>
    %c1_100 = arith.constant 1 : index
    %c0_101 = arith.constant 0 : index
    %c16 = arith.constant 16 : index
    %127 = vector.load %arg28[%c1_100, %c0_101, %c16] : memref<2x3x96xf32, #tpu.memory_space<vmem>>, vector<1x1x64xf32>
    %128 = vector.shape_cast %127 : vector<1x1x64xf32> to vector<1x64xf32>
    %129 = vector.shape_cast %126 : vector<1x64xf32> to vector<1x1x64xf32>
    tpu.vector_store %arg28[%c1_100, %c0_101, %c16], %129 {strides = array<i32>} : memref<2x3x96xf32, #tpu.memory_space<vmem>>, vector<1x1x64xf32>,
    %130 = vector.extract_strided_slice %123 {offsets = [1, 0], sizes = [1, 64], strides = [1, 1]} : vector<4x64xf32> to vector<1x64xf32>
    %c0_102 = arith.constant 0 : index
    %c1_103 = arith.constant 1 : index
    %c16_104 = arith.constant 16 : index
    %131 = vector.load %arg28[%c0_102, %c1_103, %c16_104] : memref<2x3x96xf32, #tpu.memory_space<vmem>>, vector<1x1x64xf32>
    %132 = vector.shape_cast %131 : vector<1x1x64xf32> to vector<1x64xf32>
    %133 = vector.shape_cast %130 : vector<1x64xf32> to vector<1x1x64xf32>
    tpu.vector_store %arg28[%c0_102, %c1_103, %c16_104], %133 {strides = array<i32>} : memref<2x3x96xf32, #tpu.memory_space<vmem>>, vector<1x1x64xf32>,
    %134 = vector.extract_strided_slice %123 {offsets = [2, 0], sizes = [1, 64], strides = [1, 1]} : vector<4x64xf32> to vector<1x64xf32>
    %c1_105 = arith.constant 1 : index
    %c1_106 = arith.constant 1 : index
    %c16_107 = arith.constant 16 : index
    %135 = vector.load %arg28[%c1_105, %c1_106, %c16_107] : memref<2x3x96xf32, #tpu.memory_space<vmem>>, vector<1x1x64xf32>
    %136 = vector.shape_cast %135 : vector<1x1x64xf32> to vector<1x64xf32>
    %137 = vector.shape_cast %134 : vector<1x64xf32> to vector<1x1x64xf32>
    tpu.vector_store %arg28[%c1_105, %c1_106, %c16_107], %137 {strides = array<i32>} : memref<2x3x96xf32, #tpu.memory_space<vmem>>, vector<1x1x64xf32>,
    %138 = vector.extract_strided_slice %123 {offsets = [3, 0], sizes = [1, 64], strides = [1, 1]} : vector<4x64xf32> to vector<1x64xf32>
    %c0_108 = arith.constant 0 : index
    %c2_109 = arith.constant 2 : index
    %c16_110 = arith.constant 16 : index
    %139 = vector.load %arg28[%c0_108, %c2_109, %c16_110] : memref<2x3x96xf32, #tpu.memory_space<vmem>>, vector<1x1x64xf32>
    %140 = vector.shape_cast %139 : vector<1x1x64xf32> to vector<1x64xf32>
    %141 = vector.shape_cast %138 : vector<1x64xf32> to vector<1x1x64xf32>
    tpu.vector_store %arg28[%c0_108, %c2_109, %c16_110], %141 {strides = array<i32>} : memref<2x3x96xf32, #tpu.memory_space<vmem>>, vector<1x1x64xf32>,
    %c0_111 = arith.constant 0 : index
    %c0_112 = arith.constant 0 : index
    %c0_113 = arith.constant 0 : index
    %142 = vector.load %arg28[%c0_111, %c0_112, %c0_113] : memref<2x3x96xf32, #tpu.memory_space<vmem>>, vector<1x2x96xf32>
    %143 = vector.shape_cast %142 : vector<1x2x96xf32> to vector<2x96xf32>
    %c0_114 = arith.constant 0 : index
    %c0_115 = arith.constant 0 : index
    %c0_116 = arith.constant 0 : index
    %144 = vector.load %arg11[%c0_114, %c0_115, %c0_116] : memref<3x96x64xf32, #tpu.memory_space<vmem>>, vector<1x96x64xf32>
    %145 = vector.shape_cast %144 : vector<1x96x64xf32> to vector<96x64xf32>
    %cst_117 = arith.constant dense<0.000000e+00> : vector<2x64xf32>
    %146 = tpu.matmul %143, %145, %cst_117 {dimension_numbers = #tpu.dot_dimension_numbers<[1], [0], [0], [1], [0, 0, 1, 1], [], []>} : vector<2x96xf32>, vector<96x64xf32>, vector<2x64xf32> -> vector<2x64xf32>
    %c1_118 = arith.constant 1 : index
    %c0_119 = arith.constant 0 : index
    %c0_120 = arith.constant 0 : index
    %147 = vector.load %arg28[%c1_118, %c0_119, %c0_120] : memref<2x3x96xf32, #tpu.memory_space<vmem>>, vector<1x2x96xf32>
    %148 = vector.shape_cast %147 : vector<1x2x96xf32> to vector<2x96xf32>
    %c1_121 = arith.constant 1 : index
    %c0_122 = arith.constant 0 : index
    %c0_123 = arith.constant 0 : index
    %149 = vector.load %arg11[%c1_121, %c0_122, %c0_123] : memref<3x96x64xf32, #tpu.memory_space<vmem>>, vector<1x96x64xf32>
    %150 = vector.shape_cast %149 : vector<1x96x64xf32> to vector<96x64xf32>
    %cst_124 = arith.constant dense<0.000000e+00> : vector<2x64xf32>
    %151 = tpu.matmul %148, %150, %cst_124 {dimension_numbers = #tpu.dot_dimension_numbers<[1], [0], [0], [1], [0, 0, 1, 1], [], []>} : vector<2x96xf32>, vector<96x64xf32>, vector<2x64xf32> -> vector<2x64xf32>
    %152 = arith.addf %146, %151 : vector<2x64xf32>
    %c0_125 = arith.constant 0 : index
    %c1_126 = arith.constant 1 : index
    %c0_127 = arith.constant 0 : index
    %153 = vector.load %arg28[%c0_125, %c1_126, %c0_127] : memref<2x3x96xf32, #tpu.memory_space<vmem>>, vector<1x2x96xf32>
    %154 = vector.shape_cast %153 : vector<1x2x96xf32> to vector<2x96xf32>
    %c2_128 = arith.constant 2 : index
    %c0_129 = arith.constant 0 : index
    %c0_130 = arith.constant 0 : index
    %155 = vector.load %arg11[%c2_128, %c0_129, %c0_130] : memref<3x96x64xf32, #tpu.memory_space<vmem>>, vector<1x96x64xf32>
    %156 = vector.shape_cast %155 : vector<1x96x64xf32> to vector<96x64xf32>
    %cst_131 = arith.constant dense<0.000000e+00> : vector<2x64xf32>
    %157 = tpu.matmul %154, %156, %cst_131 {dimension_numbers = #tpu.dot_dimension_numbers<[1], [0], [0], [1], [0, 0, 1, 1], [], []>} : vector<2x96xf32>, vector<96x64xf32>, vector<2x64xf32> -> vector<2x64xf32>
    %158 = arith.addf %152, %157 : vector<2x64xf32>
    %cst_132 = arith.constant dense<0.000000e+00> : vector<64xf32>
    %159 = vector.multi_reduction <add>, %158, %cst_132 [0] : vector<2x64xf32> to vector<64xf32>
    %160 = vector.shape_cast %159 : vector<64xf32> to vector<1x64xf32>
    %161 = arith.mulf %158, %158 : vector<2x64xf32>
    %cst_133 = arith.constant dense<0.000000e+00> : vector<64xf32>
    %162 = vector.multi_reduction <add>, %161, %cst_133 [0] : vector<2x64xf32> to vector<64xf32>
    %163 = vector.shape_cast %162 : vector<64xf32> to vector<1x64xf32>
    %c0_134 = arith.constant 0 : index
    %c0_135 = arith.constant 0 : index
    %164 = vector.load %arg14[%c0_134, %c0_135] : memref<64x64xf32, #tpu.memory_space<vmem>>, vector<64x64xf32>
    %cst_136 = arith.constant dense<0.000000e+00> : vector<1x64xf32>
    %165 = tpu.matmul %160, %164, %cst_136 {dimension_numbers = #tpu.dot_dimension_numbers<[1], [0], [0], [1], [0, 0, 1, 1], [], []>} : vector<1x64xf32>, vector<64x64xf32>, vector<1x64xf32> -> vector<1x64xf32>
    %c0_137 = arith.constant 0 : index
    %c0_138 = arith.constant 0 : index
    %166 = vector.load %arg14[%c0_137, %c0_138] : memref<64x64xf32, #tpu.memory_space<vmem>>, vector<64x64xf32>
    %cst_139 = arith.constant dense<0.000000e+00> : vector<1x64xf32>
    %167 = tpu.matmul %163, %166, %cst_139 {dimension_numbers = #tpu.dot_dimension_numbers<[1], [0], [0], [1], [0, 0, 1, 1], [], []>} : vector<1x64xf32>, vector<64x64xf32>, vector<1x64xf32> -> vector<1x64xf32>
    %168 = arith.mulf %165, %165 : vector<1x64xf32>
    %169 = arith.subf %167, %168 : vector<1x64xf32>
    %170 = vector.broadcast %165 : vector<1x64xf32> to vector<2x64xf32>
    %171 = arith.subf %158, %170 : vector<2x64xf32>
    %cst_140 = arith.constant 9.99999974E-6 : f32
    %172 = vector.broadcast %cst_140 : f32 to vector<1x64xf32>
    %173 = arith.addf %169, %172 : vector<1x64xf32>
    %174 = math.rsqrt %173 : vector<1x64xf32>
    %c0_141 = arith.constant 0 : index
    %c0_142 = arith.constant 0 : index
    %175 = vector.load %arg12[%c0_141, %c0_142] : memref<1x64xf32, #tpu.memory_space<vmem>>, vector<1x64xf32>
    %176 = arith.mulf %174, %175 : vector<1x64xf32>
    %177 = vector.broadcast %176 : vector<1x64xf32> to vector<2x64xf32>
    %178 = arith.mulf %171, %177 : vector<2x64xf32>
    %c0_143 = arith.constant 0 : index
    %c0_144 = arith.constant 0 : index
    %179 = vector.load %arg13[%c0_143, %c0_144] : memref<1x64xf32, #tpu.memory_space<vmem>>, vector<1x64xf32>
    %180 = vector.broadcast %179 : vector<1x64xf32> to vector<2x64xf32>
    %181 = arith.addf %178, %180 : vector<2x64xf32>
    %cst_145 = arith.constant 0.000000e+00 : f32
    %182 = vector.broadcast %cst_145 : f32 to vector<2x64xf32>
    %183 = arith.cmpf oge, %181, %182 : vector<2x64xf32>
    %cst_146 = arith.constant 2.000000e-01 : f32
    %184 = vector.broadcast %cst_146 : f32 to vector<2x64xf32>
    %185 = arith.mulf %184, %181 : vector<2x64xf32>
    %186 = arith.select %183, %181, %185 : vector<2x64xi1>, vector<2x64xf32>
    %cst_147 = arith.constant 0.000000e+00 : f32
    %187 = vector.broadcast %cst_147 : f32 to vector<2x2x128xf32>
    %c0_148 = arith.constant 0 : index
    %c0_149 = arith.constant 0 : index
    %c0_150 = arith.constant 0 : index
    %188 = vector.load %arg29[%c0_148, %c0_149, %c0_150] : memref<2x2x128xf32, #tpu.memory_space<vmem>>, vector<2x2x128xf32>
    tpu.vector_store %arg29[%c0_148, %c0_149, %c0_150], %187 {strides = array<i32>} : memref<2x2x128xf32, #tpu.memory_space<vmem>>, vector<2x2x128xf32>,
    %189 = vector.extract_strided_slice %186 {offsets = [0, 0], sizes = [1, 64], strides = [1, 1]} : vector<2x64xf32> to vector<1x64xf32>
    %c1_151 = arith.constant 1 : index
    %c0_152 = arith.constant 0 : index
    %c32 = arith.constant 32 : index
    %190 = vector.load %arg29[%c1_151, %c0_152, %c32] : memref<2x2x128xf32, #tpu.memory_space<vmem>>, vector<1x1x64xf32>
    %191 = vector.shape_cast %190 : vector<1x1x64xf32> to vector<1x64xf32>
    %192 = vector.shape_cast %189 : vector<1x64xf32> to vector<1x1x64xf32>
    tpu.vector_store %arg29[%c1_151, %c0_152, %c32], %192 {strides = array<i32>} : memref<2x2x128xf32, #tpu.memory_space<vmem>>, vector<1x1x64xf32>,
    %193 = vector.extract_strided_slice %186 {offsets = [1, 0], sizes = [1, 64], strides = [1, 1]} : vector<2x64xf32> to vector<1x64xf32>
    %c0_153 = arith.constant 0 : index
    %c1_154 = arith.constant 1 : index
    %c32_155 = arith.constant 32 : index
    %194 = vector.load %arg29[%c0_153, %c1_154, %c32_155] : memref<2x2x128xf32, #tpu.memory_space<vmem>>, vector<1x1x64xf32>
    %195 = vector.shape_cast %194 : vector<1x1x64xf32> to vector<1x64xf32>
    %196 = vector.shape_cast %193 : vector<1x64xf32> to vector<1x1x64xf32>
    tpu.vector_store %arg29[%c0_153, %c1_154, %c32_155], %196 {strides = array<i32>} : memref<2x2x128xf32, #tpu.memory_space<vmem>>, vector<1x1x64xf32>,
    %c0_156 = arith.constant 0 : index
    %c0_157 = arith.constant 0 : index
    %c0_158 = arith.constant 0 : index
    %197 = vector.load %arg29[%c0_156, %c0_157, %c0_158] : memref<2x2x128xf32, #tpu.memory_space<vmem>>, vector<1x1x128xf32>
    %198 = vector.shape_cast %197 : vector<1x1x128xf32> to vector<1x128xf32>
    %c0_159 = arith.constant 0 : index
    %c0_160 = arith.constant 0 : index
    %c0_161 = arith.constant 0 : index
    %199 = vector.load %arg15[%c0_159, %c0_160, %c0_161] : memref<3x128x32xf32, #tpu.memory_space<vmem>>, vector<1x128x32xf32>
    %200 = vector.shape_cast %199 : vector<1x128x32xf32> to vector<128x32xf32>
    %cst_162 = arith.constant dense<0.000000e+00> : vector<1x32xf32>
    %201 = tpu.matmul %198, %200, %cst_162 {dimension_numbers = #tpu.dot_dimension_numbers<[1], [0], [0], [1], [0, 0, 1, 1], [], []>} : vector<1x128xf32>, vector<128x32xf32>, vector<1x32xf32> -> vector<1x32xf32>
    %c1_163 = arith.constant 1 : index
    %c0_164 = arith.constant 0 : index
    %c0_165 = arith.constant 0 : index
    %202 = vector.load %arg29[%c1_163, %c0_164, %c0_165] : memref<2x2x128xf32, #tpu.memory_space<vmem>>, vector<1x1x128xf32>
    %203 = vector.shape_cast %202 : vector<1x1x128xf32> to vector<1x128xf32>
    %c1_166 = arith.constant 1 : index
    %c0_167 = arith.constant 0 : index
    %c0_168 = arith.constant 0 : index
    %204 = vector.load %arg15[%c1_166, %c0_167, %c0_168] : memref<3x128x32xf32, #tpu.memory_space<vmem>>, vector<1x128x32xf32>
    %205 = vector.shape_cast %204 : vector<1x128x32xf32> to vector<128x32xf32>
    %cst_169 = arith.constant dense<0.000000e+00> : vector<1x32xf32>
    %206 = tpu.matmul %203, %205, %cst_169 {dimension_numbers = #tpu.dot_dimension_numbers<[1], [0], [0], [1], [0, 0, 1, 1], [], []>} : vector<1x128xf32>, vector<128x32xf32>, vector<1x32xf32> -> vector<1x32xf32>
    %207 = arith.addf %201, %206 : vector<1x32xf32>
    %c0_170 = arith.constant 0 : index
    %c1_171 = arith.constant 1 : index
    %c0_172 = arith.constant 0 : index
    %208 = vector.load %arg29[%c0_170, %c1_171, %c0_172] : memref<2x2x128xf32, #tpu.memory_space<vmem>>, vector<1x1x128xf32>
    %209 = vector.shape_cast %208 : vector<1x1x128xf32> to vector<1x128xf32>
    %c2_173 = arith.constant 2 : index
    %c0_174 = arith.constant 0 : index
    %c0_175 = arith.constant 0 : index
    %210 = vector.load %arg15[%c2_173, %c0_174, %c0_175] : memref<3x128x32xf32, #tpu.memory_space<vmem>>, vector<1x128x32xf32>
    %211 = vector.shape_cast %210 : vector<1x128x32xf32> to vector<128x32xf32>
    %cst_176 = arith.constant dense<0.000000e+00> : vector<1x32xf32>
    %212 = tpu.matmul %209, %211, %cst_176 {dimension_numbers = #tpu.dot_dimension_numbers<[1], [0], [0], [1], [0, 0, 1, 1], [], []>} : vector<1x128xf32>, vector<128x32xf32>, vector<1x32xf32> -> vector<1x32xf32>
    %213 = arith.addf %207, %212 : vector<1x32xf32>
    %c0_177 = arith.constant 0 : index
    %c0_178 = arith.constant 0 : index
    %214 = vector.load %arg16[%c0_177, %c0_178] : memref<1x32xf32, #tpu.memory_space<vmem>>, vector<1x32xf32>
    %215 = arith.addf %213, %214 : vector<1x32xf32>
    %cst_179 = arith.constant 0.000000e+00 : f32
    %216 = vector.broadcast %cst_179 : f32 to vector<1x32xf32>
    %217 = arith.cmpf oge, %215, %216 : vector<1x32xf32>
    %cst_180 = arith.constant 2.000000e-01 : f32
    %218 = vector.broadcast %cst_180 : f32 to vector<1x32xf32>
    %219 = arith.mulf %218, %215 : vector<1x32xf32>
    %220 = arith.select %217, %215, %219 : vector<1x32xi1>, vector<1x32xf32>
    %c0_181 = arith.constant 0 : index
    %c0_182 = arith.constant 0 : index
    %c0_183 = arith.constant 0 : index
    %221 = vector.load %arg2[%c0_181, %c0_182, %c0_183] : memref<1x1x32xf32, #tpu.memory_space<vmem>>, vector<1x1x32xf32>
    %222 = vector.shape_cast %221 : vector<1x1x32xf32> to vector<1x32xf32>
    %c0_184 = arith.constant 0 : index
    %c0_185 = arith.constant 0 : index
    %223 = vector.load %arg17[%c0_184, %c0_185] : memref<32x32xf32, #tpu.memory_space<vmem>>, vector<32x32xf32>
    %cst_186 = arith.constant dense<0.000000e+00> : vector<1x32xf32>
    %224 = tpu.matmul %220, %223, %cst_186 {dimension_numbers = #tpu.dot_dimension_numbers<[1], [0], [0], [1], [0, 0, 1, 1], [], []>} : vector<1x32xf32>, vector<32x32xf32>, vector<1x32xf32> -> vector<1x32xf32>
    %c0_187 = arith.constant 0 : index
    %c0_188 = arith.constant 0 : index
    %225 = vector.load %arg18[%c0_187, %c0_188] : memref<32x32xf32, #tpu.memory_space<vmem>>, vector<32x32xf32>
    %cst_189 = arith.constant dense<0.000000e+00> : vector<1x32xf32>
    %226 = tpu.matmul %222, %225, %cst_189 {dimension_numbers = #tpu.dot_dimension_numbers<[1], [0], [0], [1], [0, 0, 1, 1], [], []>} : vector<1x32xf32>, vector<32x32xf32>, vector<1x32xf32> -> vector<1x32xf32>
    %227 = arith.addf %224, %226 : vector<1x32xf32>
    %c0_190 = arith.constant 0 : index
    %c0_191 = arith.constant 0 : index
    %228 = vector.load %arg19[%c0_190, %c0_191] : memref<1x32xf32, #tpu.memory_space<vmem>>, vector<1x32xf32>
    %229 = arith.addf %227, %228 : vector<1x32xf32>
    %cst_192 = arith.constant 0.000000e+00 : f32
    %230 = vector.broadcast %cst_192 : f32 to vector<1x32xf32>
    %231 = arith.cmpf oge, %229, %230 : vector<1x32xf32>
    %cst_193 = arith.constant 2.000000e-01 : f32
    %232 = vector.broadcast %cst_193 : f32 to vector<1x32xf32>
    %233 = arith.mulf %232, %229 : vector<1x32xf32>
    %234 = arith.select %231, %229, %233 : vector<1x32xi1>, vector<1x32xf32>
    %cst_194 = arith.constant 1.41421354 : f32
    %235 = vector.broadcast %cst_194 : f32 to vector<1x32xf32>
    %236 = arith.mulf %234, %235 : vector<1x32xf32>
    %c0_195 = arith.constant 0 : index
    %c0_196 = arith.constant 0 : index
    %237 = vector.load %arg20[%c0_195, %c0_196] : memref<32x32xf32, #tpu.memory_space<vmem>>, vector<32x32xf32>
    %cst_197 = arith.constant dense<0.000000e+00> : vector<1x32xf32>
    %238 = tpu.matmul %236, %237, %cst_197 {dimension_numbers = #tpu.dot_dimension_numbers<[1], [0], [0], [1], [0, 0, 1, 1], [], []>} : vector<1x32xf32>, vector<32x32xf32>, vector<1x32xf32> -> vector<1x32xf32>
    %c0_198 = arith.constant 0 : index
    %c0_199 = arith.constant 0 : index
    %239 = vector.load %arg21[%c0_198, %c0_199] : memref<1x32xf32, #tpu.memory_space<vmem>>, vector<1x32xf32>
    %240 = arith.addf %238, %239 : vector<1x32xf32>
    %cst_200 = arith.constant 0.000000e+00 : f32
    %241 = vector.broadcast %cst_200 : f32 to vector<1x32xf32>
    %242 = arith.cmpf oge, %240, %241 : vector<1x32xf32>
    %cst_201 = arith.constant 2.000000e-01 : f32
    %243 = vector.broadcast %cst_201 : f32 to vector<1x32xf32>
    %244 = arith.mulf %243, %240 : vector<1x32xf32>
    %245 = arith.select %242, %240, %244 : vector<1x32xi1>, vector<1x32xf32>
    %cst_202 = arith.constant 1.41421354 : f32
    %246 = vector.broadcast %cst_202 : f32 to vector<1x32xf32>
    %247 = arith.mulf %245, %246 : vector<1x32xf32>
    %c0_203 = arith.constant 0 : index
    %c0_204 = arith.constant 0 : index
    %248 = vector.load %arg22[%c0_203, %c0_204] : memref<32x32xf32, #tpu.memory_space<vmem>>, vector<32x32xf32>
    %cst_205 = arith.constant dense<0.000000e+00> : vector<1x32xf32>
    %249 = tpu.matmul %247, %248, %cst_205 {dimension_numbers = #tpu.dot_dimension_numbers<[1], [0], [0], [1], [0, 0, 1, 1], [], []>} : vector<1x32xf32>, vector<32x32xf32>, vector<1x32xf32> -> vector<1x32xf32>
    %c0_206 = arith.constant 0 : index
    %c0_207 = arith.constant 0 : index
    %250 = vector.load %arg23[%c0_206, %c0_207] : memref<1x32xf32, #tpu.memory_space<vmem>>, vector<1x32xf32>
    %251 = arith.addf %249, %250 : vector<1x32xf32>
    %cst_208 = arith.constant 0.000000e+00 : f32
    %252 = vector.broadcast %cst_208 : f32 to vector<1x32xf32>
    %253 = arith.cmpf oge, %251, %252 : vector<1x32xf32>
    %cst_209 = arith.constant 2.000000e-01 : f32
    %254 = vector.broadcast %cst_209 : f32 to vector<1x32xf32>
    %255 = arith.mulf %254, %251 : vector<1x32xf32>
    %256 = arith.select %253, %251, %255 : vector<1x32xi1>, vector<1x32xf32>
    %cst_210 = arith.constant 1.41421354 : f32
    %257 = vector.broadcast %cst_210 : f32 to vector<1x32xf32>
    %258 = arith.mulf %256, %257 : vector<1x32xf32>
    %c0_211 = arith.constant 0 : index
    %c0_212 = arith.constant 0 : index
    %259 = vector.load %arg24[%c0_211, %c0_212] : memref<32x32xf32, #tpu.memory_space<vmem>>, vector<32x32xf32>
    %cst_213 = arith.constant dense<0.000000e+00> : vector<1x32xf32>
    %260 = tpu.matmul %258, %259, %cst_213 {dimension_numbers = #tpu.dot_dimension_numbers<[1], [0], [0], [1], [0, 0, 1, 1], [], []>} : vector<1x32xf32>, vector<32x32xf32>, vector<1x32xf32> -> vector<1x32xf32>
    %c0_214 = arith.constant 0 : index
    %c0_215 = arith.constant 0 : index
    %261 = vector.load %arg25[%c0_214, %c0_215] : memref<1x32xf32, #tpu.memory_space<vmem>>, vector<1x32xf32>
    %262 = arith.addf %260, %261 : vector<1x32xf32>
    %cst_216 = arith.constant 0.000000e+00 : f32
    %263 = vector.broadcast %cst_216 : f32 to vector<1x32xf32>
    %264 = arith.cmpf oge, %262, %263 : vector<1x32xf32>
    %cst_217 = arith.constant 2.000000e-01 : f32
    %265 = vector.broadcast %cst_217 : f32 to vector<1x32xf32>
    %266 = arith.mulf %265, %262 : vector<1x32xf32>
    %267 = arith.select %264, %262, %266 : vector<1x32xi1>, vector<1x32xf32>
    %cst_218 = arith.constant 1.41421354 : f32
    %268 = vector.broadcast %cst_218 : f32 to vector<1x32xf32>
    %269 = arith.mulf %267, %268 : vector<1x32xf32>
    %c0_219 = arith.constant 0 : index
    %c0_220 = arith.constant 0 : index
    %c0_221 = arith.constant 0 : index
    %270 = vector.load %arg26[%c0_219, %c0_220, %c0_221] : memref<1x1x32xf32, #tpu.memory_space<vmem>>, vector<1x1x32xf32>
    %271 = vector.shape_cast %270 : vector<1x1x32xf32> to vector<1x32xf32>
    %272 = vector.shape_cast %269 : vector<1x32xf32> to vector<1x1x32xf32>
    tpu.vector_store %arg26[%c0_219, %c0_220, %c0_221], %272 {strides = array<i32>} : memref<1x1x32xf32, #tpu.memory_space<vmem>>, vector<1x1x32xf32>,
    return
  }
  func.func @transform_0(%arg0: i32) -> (i32, i32, i32, i32) {
    %c0_i32 = arith.constant 0 : i32
    %c0_i32_0 = arith.constant 0 : i32
    %c0_i32_1 = arith.constant 0 : i32
    %c0_i32_2 = arith.constant 0 : i32
    return %arg0, %c0_i32, %c0_i32_0, %c0_i32_1 : i32, i32, i32, i32
  }
  func.func @transform_1(%arg0: i32) -> (i32, i32, i32) {
    %c0_i32 = arith.constant 0 : i32
    %c0_i32_0 = arith.constant 0 : i32
    %c0_i32_1 = arith.constant 0 : i32
    return %arg0, %c0_i32, %c0_i32_0 : i32, i32, i32
  }
  func.func @transform_2(%arg0: i32) -> (i32, i32, i32) {
    %c0_i32 = arith.constant 0 : i32
    %c0_i32_0 = arith.constant 0 : i32
    %c0_i32_1 = arith.constant 0 : i32
    %c0_i32_2 = arith.constant 0 : i32
    return %c0_i32, %c0_i32_0, %c0_i32_1 : i32, i32, i32
  }
  func.func @transform_3(%arg0: i32) -> (i32, i32) {
    %c0_i32 = arith.constant 0 : i32
    %c0_i32_0 = arith.constant 0 : i32
    %c0_i32_1 = arith.constant 0 : i32
    return %c0_i32, %c0_i32_0 : i32, i32
  }
  func.func @transform_4(%arg0: i32) -> (i32, i32) {
    %c0_i32 = arith.constant 0 : i32
    %c0_i32_0 = arith.constant 0 : i32
    %c0_i32_1 = arith.constant 0 : i32
    return %c0_i32, %c0_i32_0 : i32, i32
  }
  func.func @transform_5(%arg0: i32) -> (i32, i32) {
    %c0_i32 = arith.constant 0 : i32
    %c0_i32_0 = arith.constant 0 : i32
    %c0_i32_1 = arith.constant 0 : i32
    return %c0_i32, %c0_i32_0 : i32, i32
  }
  func.func @transform_6(%arg0: i32) -> (i32, i32, i32) {
    %c0_i32 = arith.constant 0 : i32
    %c0_i32_0 = arith.constant 0 : i32
    %c0_i32_1 = arith.constant 0 : i32
    %c0_i32_2 = arith.constant 0 : i32
    return %c0_i32, %c0_i32_0, %c0_i32_1 : i32, i32, i32
  }
  func.func @transform_7(%arg0: i32) -> (i32, i32) {
    %c0_i32 = arith.constant 0 : i32
    %c0_i32_0 = arith.constant 0 : i32
    %c0_i32_1 = arith.constant 0 : i32
    return %c0_i32, %c0_i32_0 : i32, i32
  }
  func.func @transform_8(%arg0: i32) -> (i32, i32) {
    %c0_i32 = arith.constant 0 : i32
    %c0_i32_0 = arith.constant 0 : i32
    %c0_i32_1 = arith.constant 0 : i32
    return %c0_i32, %c0_i32_0 : i32, i32
  }
  func.func @transform_9(%arg0: i32) -> (i32, i32) {
    %c0_i32 = arith.constant 0 : i32
    %c0_i32_0 = arith.constant 0 : i32
    %c0_i32_1 = arith.constant 0 : i32
    return %c0_i32, %c0_i32_0 : i32, i32
  }
  func.func @transform_10(%arg0: i32) -> (i32, i32, i32) {
    %c0_i32 = arith.constant 0 : i32
    %c0_i32_0 = arith.constant 0 : i32
    %c0_i32_1 = arith.constant 0 : i32
    %c0_i32_2 = arith.constant 0 : i32
    return %c0_i32, %c0_i32_0, %c0_i32_1 : i32, i32, i32
  }
  func.func @transform_11(%arg0: i32) -> (i32, i32) {
    %c0_i32 = arith.constant 0 : i32
    %c0_i32_0 = arith.constant 0 : i32
    %c0_i32_1 = arith.constant 0 : i32
    return %c0_i32, %c0_i32_0 : i32, i32
  }
  func.func @transform_12(%arg0: i32) -> (i32, i32) {
    %c0_i32 = arith.constant 0 : i32
    %c0_i32_0 = arith.constant 0 : i32
    %c0_i32_1 = arith.constant 0 : i32
    return %c0_i32, %c0_i32_0 : i32, i32
  }
  func.func @transform_13(%arg0: i32) -> (i32, i32) {
    %c0_i32 = arith.constant 0 : i32
    %c0_i32_0 = arith.constant 0 : i32
    %c0_i32_1 = arith.constant 0 : i32
    return %c0_i32, %c0_i32_0 : i32, i32
  }
  func.func @transform_14(%arg0: i32) -> (i32, i32, i32) {
    %c0_i32 = arith.constant 0 : i32
    %c0_i32_0 = arith.constant 0 : i32
    %c0_i32_1 = arith.constant 0 : i32
    %c0_i32_2 = arith.constant 0 : i32
    return %c0_i32, %c0_i32_0, %c0_i32_1 : i32, i32, i32
  }
  func.func @transform_15(%arg0: i32) -> (i32, i32) {
    %c0_i32 = arith.constant 0 : i32
    %c0_i32_0 = arith.constant 0 : i32
    %c0_i32_1 = arith.constant 0 : i32
    return %c0_i32, %c0_i32_0 : i32, i32
  }
  func.func @transform_16(%arg0: i32) -> (i32, i32) {
    %c0_i32 = arith.constant 0 : i32
    %c0_i32_0 = arith.constant 0 : i32
    %c0_i32_1 = arith.constant 0 : i32
    return %c0_i32, %c0_i32_0 : i32, i32
  }
  func.func @transform_17(%arg0: i32) -> (i32, i32) {
    %c0_i32 = arith.constant 0 : i32
    %c0_i32_0 = arith.constant 0 : i32
    %c0_i32_1 = arith.constant 0 : i32
    return %c0_i32, %c0_i32_0 : i32, i32
  }
  func.func @transform_18(%arg0: i32) -> (i32, i32) {
    %c0_i32 = arith.constant 0 : i32
    %c0_i32_0 = arith.constant 0 : i32
    %c0_i32_1 = arith.constant 0 : i32
    return %c0_i32, %c0_i32_0 : i32, i32
  }
  func.func @transform_19(%arg0: i32) -> (i32, i32) {
    %c0_i32 = arith.constant 0 : i32
    %c0_i32_0 = arith.constant 0 : i32
    %c0_i32_1 = arith.constant 0 : i32
    return %c0_i32, %c0_i32_0 : i32, i32
  }
  func.func @transform_20(%arg0: i32) -> (i32, i32) {
    %c0_i32 = arith.constant 0 : i32
    %c0_i32_0 = arith.constant 0 : i32
    %c0_i32_1 = arith.constant 0 : i32
    return %c0_i32, %c0_i32_0 : i32, i32
  }
  func.func @transform_21(%arg0: i32) -> (i32, i32) {
    %c0_i32 = arith.constant 0 : i32
    %c0_i32_0 = arith.constant 0 : i32
    %c0_i32_1 = arith.constant 0 : i32
    return %c0_i32, %c0_i32_0 : i32, i32
  }
  func.func @transform_22(%arg0: i32) -> (i32, i32) {
    %c0_i32 = arith.constant 0 : i32
    %c0_i32_0 = arith.constant 0 : i32
    %c0_i32_1 = arith.constant 0 : i32
    return %c0_i32, %c0_i32_0 : i32, i32
  }
  func.func @transform_23(%arg0: i32) -> (i32, i32) {
    %c0_i32 = arith.constant 0 : i32
    %c0_i32_0 = arith.constant 0 : i32
    %c0_i32_1 = arith.constant 0 : i32
    return %c0_i32, %c0_i32_0 : i32, i32
  }
  func.func @transform_24(%arg0: i32) -> (i32, i32) {
    %c0_i32 = arith.constant 0 : i32
    %c0_i32_0 = arith.constant 0 : i32
    %c0_i32_1 = arith.constant 0 : i32
    return %c0_i32, %c0_i32_0 : i32, i32
  }
  func.func @transform_25(%arg0: i32) -> (i32, i32, i32) {
    %c0_i32 = arith.constant 0 : i32
    %c0_i32_0 = arith.constant 0 : i32
    %c0_i32_1 = arith.constant 0 : i32
    return %arg0, %c0_i32, %c0_i32_0 : i32, i32, i32
  }
}

</mosaic_0001>

<bundles_post_ra>
// kernel: forward.1
= control target key start
LH: loop header
LB: loop body
LE: loop exit
PB: predicated region body
PF: predicated region fallthrough
CT: control target
= control target key end

     0   :  { %s5115_s0 = inlined_call_operand.vmem [shape: f32[2,2,9,144], index: 0, kind: input, shape index: {}]   ;;  %s5116_s1 = inlined_call_operand.vmem [shape: f32[2,1,32], index: 1, kind: input, shape index: {}]   ;;  %s5117_s2 = inlined_call_operand.vmem [shape: f32[3,144,64], index: 2, kind: input, shape index: {}]   ;;  %s5118_s3 = inlined_call_operand.vmem [shape: f32[1,64], index: 3, kind: input, shape index: {}]   ;;  %s5119_s4 = inlined_call_operand.vmem [shape: f32[1,64], index: 4, kind: input, shape index: {}]   ;;  %s5120_s5 = inlined_call_operand.vmem [shape: f32[64,64], index: 5, kind: input, shape index: {}]   ;;  %s5121_s6 = inlined_call_operand.vmem [shape: f32[3,80,64], index: 6, kind: input, shape index: {}]   ;;  %s5122_s7 = inlined_call_operand.vmem [shape: f32[1,64], index: 7, kind: input, shape index: {}]   ;;  %s5123_s8 = inlined_call_operand.vmem [shape: f32[1,64], index: 8, kind: input, shape index: {}]   ;;  %s5124_s9 = inlined_call_operand.vmem [shape: f32[64,64], index: 9, kind: input, shape index: {}]   ;;  %s5125_s10 = inlined_call_operand.vmem [shape: f32[3,96,64], index: 10, kind: input, shape index: {}]   ;;  %s5126_s11 = inlined_call_operand.vmem [shape: f32[1,64], index: 11, kind: input, shape index: {}]   ;;  %s5127_s12 = inlined_call_operand.vmem [shape: f32[1,64], index: 12, kind: input, shape index: {}]   ;;  %s5128_s13 = inlined_call_operand.vmem [shape: f32[64,64], index: 13, kind: input, shape index: {}]   ;;  %s5129_s14 = inlined_call_operand.vmem [shape: f32[3,128,32], index: 14, kind: input, shape index: {}]   ;;  %s5130_s15 = inlined_call_operand.vmem [shape: f32[1,32], index: 15, kind: input, shape index: {}]   ;;  %s5131_s16 = inlined_call_operand.vmem [shape: f32[32,32], index: 16, kind: input, shape index: {}]   ;;  %s5132_s17 = inlined_call_operand.vmem [shape: f32[32,32], index: 17, kind: input, shape index: {}]   ;;  %s5133_s18 = inlined_call_operand.vmem [shape: f32[1,32], index: 18, kind: input, shape index: {}]   ;;  %s5134_s19 = inlined_call_operand.vmem [shape: f32[32,32], index: 19, kind: input, shape index: {}]   ;;  %s5135_s20 = inlined_call_operand.vmem [shape: f32[1,32], index: 20, kind: input, shape index: {}]   ;;  %s5136_s21 = inlined_call_operand.vmem [shape: f32[32,32], index: 21, kind: input, shape index: {}]   ;;  %s5137_s22 = inlined_call_operand.vmem [shape: f32[1,32], index: 22, kind: input, shape index: {}]   ;;  %s5138_s23 = inlined_call_operand.vmem [shape: f32[32,32], index: 23, kind: input, shape index: {}]   ;;  %s5139_s24 = inlined_call_operand.vmem [shape: f32[1,32], index: 24, kind: input, shape index: {}]   ;;  %s5140_s25 = inlined_call_operand.hbm [shape: f32[2,1,32], index: 25, kind: output, shape index: {}]  }
   0x1   :  { %5155 = sst [smem:[#allocation14_spill]] %s5115_s0 }
   0x2   :  { %5156 = sst [smem:[#allocation15_spill]] %s5116_s1 }
   0x3   :  { %5157 = sst [smem:[#allocation16_spill]] %s5117_s2 }
   0x4   :  { %5158 = sst [smem:[#allocation17_spill]] %s5118_s3 }
   0x5   :  { %5159 = sst [smem:[#allocation18_spill]] %s5119_s4 }
   0x6   :  { %5160 = sst [smem:[#allocation19_spill]] %s5120_s5 }
   0x7   :  { %5161 = sst [smem:[#allocation20_spill]] %s5121_s6 }
   0x8   :  { %5162 = sst [smem:[#allocation21_spill]] %s5122_s7 }
   0x9   :  { %5163 = sst [smem:[#allocation22_spill]] %s5123_s8 }
   0xa   :  { %5164 = sst [smem:[#allocation23_spill]] %s5124_s9 }
   0xb   :  { %5165 = sst [smem:[#allocation24_spill]] %s5125_s10 }
   0xc   :  { %5166 = sst [smem:[#allocation25_spill]] %s5140_s25 }
   0xd   :  { %30 = vsyncpa [#allocation6], 0 }
   0xe   :  { %32 = vsyncpa [#allocation6 + $0x1], 0  ;;  %s4010_s29 = smov 0   ;;  %s4012_s2 = smov 0  }
   0xf   :  { %s4014_s6 = smov 0   ;;  %s4016_s30 = smov 0  }
  0x10 LB: > { %5167 = sst [smem:[#allocation8_spill]] %s3860_s29  ;;  %s4031_s7 = sadd.s32 4294967295, %s3872_s30   ;;  %s3872_s30 = sphi %s4016_s30, %s5190_s30   ;;  %s3868_s6 = sphi %s4014_s6, %s5192_s6   ;;  %s3864_s2 = sphi %s4012_s2, %s5194_s2   ;;  %s3860_s29 = sphi %s4010_s29, %s5193_s29  }
  0x11   : > { %5168 = sst [smem:[#allocation9_spill]] %s3868_s6  ;;  %s2989_s3 = sadd.s32 4294967294, %s3872_s30  }
  0x12   : > { %5169 = sst [smem:[#allocation10_spill]] %s3872_s30  ;;  %s4035_s26 = sadd.s32 1, %s3872_s30  }
  0x13   : > { %5170 = sst [smem:[#allocation11_spill]] %s4035_s26  ;;  %s580_s1 = sadd.s32 1, %s3868_s6 }
  0x14   : > { %s577_s8 = ssub.s32 %s3872_s30, %s4035_s26  ;;  %p590_p0 = scmp.ne.s32.totalorder %s3868_s6, %s3864_s2 }
  0x15   : > { %p578_p1 = scmp.eq.s32.totalorder %s577_s8, 0  ;;  %p591_p2 = scmp.eq.s32.totalorder %s4031_s7, 1 }
  0x16   : > { %p596_p3 = scmp.ne.s32.totalorder %s3864_s2, %s3860_s29  ;;  %p597_p4 = scmp.eq.s32.totalorder %s2989_s3, 1 }
  0x17   : > { %s4046_s27 = scalar_select %p578_p1, %s3868_s6, %s580_s1  }
  0x18   : > { %p4048_p5 = por %p591_p2, %p590_p0  ;;  %p4052_p6 = por %p597_p4, %p596_p3 }
  0x19   : > { %5171 = sst [smem:[#allocation12_spill]] %s4046_s27  ;;  %p2992_p7 = scmp.ge.s32.totalorder %s3872_s30, 1 }
  0x1a   : > { %s5173_s28 = scalar_select %p4052_p6, 1, 0 }
  0x1b   : > { %p698_p8 = scmp.lt.s32.totalorder %s3872_s30, 3 }
  0x1c   : > { %5174 = sst [smem:[#allocation13_spill]] %s5173_s28 }
  0x1d   : > { %p699_p9 = pnand %p2992_p7, %p698_p8 }
  0x1e   : > { %s5175_s0 = sld [smem:[#allocation16_spill]] (!%p699_p9)  ;;  %p768_p10 = scmp.lt.s32.totalorder (!%p699_p9), %s4031_s7, 1 }
  0x1f   : > { %702 = sbr.rel (%p699_p9) target bundleno = 2902 (0xb56), region = 120  ;;  %s5176_s30 = sld [smem:[#allocation14_spill]] (!%p699_p9) }
  0x20   : > { %s5179_s3 = sld [smem:[#allocation17_spill]] (!%p699_p9)  ;;  %s3876_s9 = smov (!%p699_p9), 8  }
  0x21   : > { %s5180_s1 = sld [smem:[#allocation18_spill]] (!%p699_p9)  ;;  %s3877_s27 = smov (!%p699_p9), 16  }
  0x22   : > { %s5181_s8 = sld [smem:[#allocation23_spill]] (!%p699_p9)  ;;  %s3132_s29 = sshll.u32 (!%p699_p9), %s4031_s7, 4 }
  0x23   : > { %s5182_s10 = sld [smem:[#allocation24_spill]] (!%p699_p9) }
  0x24   : > { %v3012_v0 = vld [vmem:[%s5175_s0 + $0x108] sm:$0xff]  ;;  %v793_v1 = vld [vmem:[%s5175_s0 + $0x78] sm:$0xff]  ;;  %v3874_v2 = vmov 0.0   ;;  %v3011_v3 = vld [vmem:[%s5175_s0 + $0x100] sm:$0xff]  ;;  %s4156_s26 = scalar_select %p768_p10, %s4031_s7, 1  ;;  %vm818_vm0 = vcmask 130048  }
  0x25   : > { %822 = vmatprep.subr.mxu0 %v3874_v2  ;;  %2222 = vst [vmem:[#allocation4] sm:$0x3] %v3874_v2  ;;  %2223 = vst [vmem:[#allocation4 + $0x2] sm:$0x3] %v3874_v2  ;;  %895 = vmatprep.subr.mxu1 %v3874_v2  ;;  %v792_v4 = vld [vmem:[%s5175_s0 + $0x70] sm:$0xff]  ;;  %v3010_v5 = vld [vmem:[%s5175_s0 + $0xf8] sm:$0xff] }
  0x26   : > { %823 = vmatpush1.msra.mxu0 %v3012_v0  ;;  %896 = vmatpush1.msra.mxu1 %v793_v1  ;;  %v791_v6 = vld [vmem:[%s5175_s0 + $0x68] sm:$0xff]  ;;  %v3009_v7 = vld [vmem:[%s5175_s0 + $0xf0] sm:$0xff]  ;;  %v790_v8 = vld [vmem:[%s5175_s0 + $0x60] sm:$0xff]  ;;  %s3135_s5 = sshll.u32 %s4156_s26, 6  ;;  %vm992_vm1 = vcmask 1046528   ;;  %vm3875_vm2 = vmmov 0  }
  0x27   : > { %824 = vmatprep.subr.mxu0 %v3874_v2  ;;  %897 = vmatprep.subr.mxu1 %v3874_v2  ;;  %v3008_v9 = vld [vmem:[%s5175_s0 + $0xe8] sm:$0xff]  ;;  %v789_v10 = vld [vmem:[%s5175_s0 + $0x58] sm:$0xff]  ;;  %v3007_v11 = vld [vmem:[%s5175_s0 + $0xe0] sm:$0xff]  ;;  %s4194_s25 = scalar_lea.vmem %s5176_s30, %s3135_s5  ;;  %s5177_s5 = sld [smem:[#allocation19_spill]]  ;;  %vm1073_vm3 = vcmask 523264   ;;  %vm1270_vm4 = vcmask 651264  }
  0x28   : > { %825 = vmatpush1.msra.mxu0 %v3011_v3  ;;  %898 = vmatpush1.msra.mxu1 %v792_v4  ;;  %v788_v12 = vld [vmem:[%s5175_s0 + $0x50] sm:$0xff]  ;;  %v3006_v13 = vld [vmem:[%s5175_s0 + $0xd8] sm:$0xff]  ;;  %v787_v14 = vld [vmem:[%s5175_s0 + $0x48] sm:$0xff]  ;;  %1271 = vst.msk [vmem:[#allocation2] sm:$0x1f] %vm1270_vm4, %v3874_v2  ;;  %vm1278_vm6 = vcmask 581696  }
  0x29   : > { %826 = vmatprep.subr.mxu0 %v3874_v2  ;;  %899 = vmatprep.subr.mxu1 %v3874_v2  ;;  %v3005_v15 = vld [vmem:[%s5175_s0 + $0xd0] sm:$0xff]  ;;  %v786_v16 = vld [vmem:[%s5175_s0 + $0x40] sm:$0xff]  ;;  %v3004_v17 = vld [vmem:[%s5175_s0 + $0xc8] sm:$0xff]  ;;  %1272 = vst.msk [vmem:[#allocation2 + $0x8] sm:$0x1f] %vm1270_vm4, %v3874_v2  ;;  %vm1280_vm7 = vcmask 582721  }
  0x2a   : > { %827 = vmatpush1.msra.mxu0 %v3010_v5  ;;  %900 = vmatpush1.msra.mxu1 %v791_v6  ;;  %v785_v18 = vld [vmem:[%s5175_s0 + $0x38] sm:$0xff]  ;;  %v3003_v19 = vld [vmem:[%s5175_s0 + $0xc0] sm:$0xff]  ;;  %v784_v20 = vld [vmem:[%s5175_s0 + $0x30] sm:$0xff]  ;;  %vm1282_vm8 = vcmask 583746   ;;  %vm1284_vm9 = vcmask 584771   ;;  %vm1286_vm10 = vcmask 585796  }
  0x2b   : > { %828 = vmatprep.subr.mxu0 %v3874_v2  ;;  %901 = vmatprep.subr.mxu1 %v3874_v2  ;;  %v3002_v21 = vld [vmem:[%s5175_s0 + $0xb8] sm:$0xff]  ;;  %v783_v22 = vld [vmem:[%s5175_s0 + $0x28] sm:$0xff]  ;;  %v3001_v23 = vld [vmem:[%s5175_s0 + $0xb0] sm:$0xff]  ;;  %vm1288_vm11 = vcmask 586821   ;;  %vm1290_vm12 = vcmask 587846   ;;  %vm1292_vm13 = vcmask 588871  }
  0x2c   : > { %829 = vmatpush1.msra.mxu0 %v3009_v7  ;;  %902 = vmatpush1.msra.mxu1 %v790_v8  ;;  %v782_v24 = vld [vmem:[%s5175_s0 + $0x20] sm:$0xff]  ;;  %v3000_v25 = vld [vmem:[%s5175_s0 + $0xa8] sm:$0xff]  ;;  %v781_v26 = vld [vmem:[%s5175_s0 + $0x18] sm:$0xff]  ;;  %vm1317_vm14 = vcmask 654336   ;;  %vm1550_vm15 = vcmask 519168   ;;  %s5184_s28 = sld [smem:[#allocation22_spill]] }
  0x2d   : > { %830 = vmatprep.subr.mxu0 %v3874_v2  ;;  %903 = vmatprep.subr.mxu1 %v3874_v2  ;;  %v2999_v27 = vld [vmem:[%s5175_s0 + $0xa0] sm:$0xff]  ;;  %v780_v28 = vld [vmem:[%s5175_s0 + $0x10] sm:$0xff]  ;;  %v2998_v29 = vld [vmem:[%s5175_s0 + $0x98] sm:$0xff]  ;;  %vm1755_vm4 = vcmask 647296  }
  0x2e   : > { %831 = vmatpush1.msra.mxu0 %v3008_v9  ;;  %904 = vmatpush1.msra.mxu1 %v789_v10  ;;  %v779_v30 = vld [vmem:[%s5175_s0 + $0x8] sm:$0xff]  ;;  %v2997_v31 = vld [vmem:[%s5175_s0 + $0x90] sm:$0xff]  ;;  %v778_v32 = vld [vmem:[%s5175_s0] sm:$0xff] }
  0x2f   : > { %832 = vmatprep.subr.mxu0 %v3874_v2  ;;  %905 = vmatprep.subr.mxu1 %v3874_v2  ;;  %v966_v33 = vld [vmem:[%s4194_s25 + $0x8] sm:$0xfe]  ;;  %v968_v34 = vld [vmem:[%s4194_s25 + $0x18] sm:$0x1]  ;;  %v3013_v38 = vld [vmem:[%s5175_s0 + $0x110] sm:$0xff] }
  0x30   : > { %833 = vmatpush1.msra.mxu0 %v3007_v11  ;;  %906 = vmatpush1.msra.mxu1 %v788_v12  ;;  %v3014_v35 = vld [vmem:[%s5175_s0 + $0x118] sm:$0xff]  ;;  %v795_v36 = vld [vmem:[%s5175_s0 + $0x88] sm:$0xff]  ;;  %v996_v39 = vrot.slane %v966_v33, 1  ;;  %v997_v40 = vrot.slane %v968_v34, 1  ;;  %v2995_v41 = vld [vmem:[%s4194_s25 + $0x20] sm:$0xff] }
  0x31   : > { %834 = vmatprep.subr.mxu0 %v3874_v2  ;;  %907 = vmatprep.subr.mxu1 %v3874_v2  ;;  %v2996_v37 = vld [vmem:[%s4194_s25 + $0x28] sm:$0xff]  ;;  %v794_v42 = vld [vmem:[%s5175_s0 + $0x80] sm:$0xff]  ;;  %v3032_v45 = vld [vmem:[%s5175_s0 + $0x198] sm:$0xff] }
  0x32   : > { %835 = vmatpush1.msra.mxu0 %v3006_v13  ;;  %908 = vmatpush1.msra.mxu1 %v787_v14  ;;  %v777_v43 = vld [vmem:[%s4194_s25 + $0x8] sm:$0xff]  ;;  %v776_v44 = vld [vmem:[%s4194_s25] sm:$0xff]  ;;  %v998_v46 = vsel %vm992_vm1, %v996_v39, %v997_v40  ;;  %v3031_v47 = vld [vmem:[%s5175_s0 + $0x190] sm:$0xff] }
  0x33   : > { %836 = vmatprep.subr.mxu0 %v3874_v2  ;;  %909 = vmatprep.subr.mxu1 %v3874_v2  ;;  %v3030_v48 = vld [vmem:[%s5175_s0 + $0x188] sm:$0xff]  ;;  %v3029_v49 = vld [vmem:[%s5175_s0 + $0x180] sm:$0xff]  ;;  %v3028_v50 = vld [vmem:[%s5175_s0 + $0x178] sm:$0xff] }
  0x34   : > { %837 = vmatpush1.msra.mxu0 %v3005_v15  ;;  %910 = vmatpush1.msra.mxu1 %v786_v16  ;;  %v3027_v51 = vld [vmem:[%s5175_s0 + $0x170] sm:$0xff]  ;;  %v3026_v52 = vld [vmem:[%s5175_s0 + $0x168] sm:$0xff]  ;;  %v3025_v53 = vld [vmem:[%s5175_s0 + $0x160] sm:$0xff] }
  0x35   : > { %838 = vmatprep.subr.mxu0 %v3874_v2  ;;  %911 = vmatprep.subr.mxu1 %v3874_v2  ;;  %v3024_v54 = vld [vmem:[%s5175_s0 + $0x158] sm:$0xff]  ;;  %v3023_v55 = vld [vmem:[%s5175_s0 + $0x150] sm:$0xff]  ;;  %v3022_v56 = vld [vmem:[%s5175_s0 + $0x148] sm:$0xff] }
  0x36   : > { %839 = vmatpush1.msra.mxu0 %v3004_v17  ;;  %912 = vmatpush1.msra.mxu1 %v785_v18  ;;  %v3021_v57 = vld [vmem:[%s5175_s0 + $0x140] sm:$0xff]  ;;  %v3020_v58 = vld [vmem:[%s5175_s0 + $0x138] sm:$0xff]  ;;  %v3019_v59 = vld [vmem:[%s5175_s0 + $0x130] sm:$0xff] }
  0x37   : > { %840 = vmatprep.subr.mxu0 %v3874_v2  ;;  %913 = vmatprep.subr.mxu1 %v3874_v2  ;;  %v3018_v60 = vld [vmem:[%s5175_s0 + $0x128] sm:$0xff]  ;;  %v965_v61 = vld [vmem:[%s4194_s25] sm:$0xfe]  ;;  %v967_v62 = vld [vmem:[%s4194_s25 + $0x10] sm:$0x1]  ;;  %s5178_s25 = sld [smem:[#allocation20_spill]] }
  0x38   : > { %841 = vmatpush1.msra.mxu0 %v3003_v19  ;;  %914 = vmatpush1.msra.mxu1 %v784_v20  ;;  %v3017_v63 = vld [vmem:[%s5175_s0 + $0x120] sm:$0xff]  ;;  %v993_v0 = vrot.slane %v965_v61, 1  ;;  %v994_v1 = vrot.slane %v967_v62, 1  ;;  %v3034_v3 = vld [vmem:[%s5175_s0 + $0x1a8] sm:$0xff]  ;;  %v1096_v6 = vld [vmem:[%s5177_s5 + $0x38] sm:$0xff] }
  0x39   : > { %842 = vmatprep.subr.mxu0 %v3874_v2  ;;  %915 = vmatprep.subr.mxu1 %v3874_v2  ;;  %v3033_v4 = vld [vmem:[%s5175_s0 + $0x1a0] sm:$0xff]  ;;  %v1095_v7 = vld [vmem:[%s5177_s5 + $0x30] sm:$0xff]  ;;  %v1094_v8 = vld [vmem:[%s5177_s5 + $0x28] sm:$0xff]  ;;  %s5185_s0 = sld [smem:[#allocation15_spill]] }
  0x3a   : > { %843 = vmatpush1.msra.mxu0 %v3002_v21  ;;  %916 = vmatpush1.msra.mxu1 %v783_v22  ;;  %v995_v5 = vsel %vm992_vm1, %v993_v0, %v994_v1  ;;  %v1093_v9 = vld [vmem:[%s5177_s5 + $0x20] sm:$0xff]  ;;  %v1092_v10 = vld [vmem:[%s5177_s5 + $0x18] sm:$0xff]  ;;  %v1091_v11 = vld [vmem:[%s5177_s5 + $0x10] sm:$0xff] }
  0x3b   : > { %844 = vmatprep.subr.mxu0 %v3874_v2  ;;  %917 = vmatprep.subr.mxu1 %v3874_v2  ;;  %v1090_v12 = vld [vmem:[%s5177_s5 + $0x8] sm:$0xff]  ;;  %v1089_v13 = vld [vmem:[%s5177_s5] sm:$0xff] }
  0x3c   : > { %845 = vmatpush1.msra.mxu0 %v3001_v23  ;;  %918 = vmatpush1.msra.mxu1 %v782_v24 }
  0x3d   : > { %846 = vmatprep.subr.mxu0 %v3874_v2  ;;  %919 = vmatprep.subr.mxu1 %v3874_v2  ;;  %v3047_v39 = vld [vmem:[%s5178_s25 + $0x90] sm:$0xff]  ;;  %v1303_v40 = vld [vmem:[%s5178_s25 + $0x40] sm:$0xff]  ;;  %v1298_v62 = vld [vmem:[%s5178_s25 + $0x18] sm:$0xff] }
  0x3e   : > { %847 = vmatpush1.msra.mxu0 %v3000_v25  ;;  %920 = vmatpush1.msra.mxu1 %v781_v26  ;;  %v1297_v0 = vld [vmem:[%s5178_s25 + $0x10] sm:$0xff] }
  0x3f   : > { %848 = vmatprep.subr.mxu0 %v3874_v2  ;;  %921 = vmatprep.subr.mxu1 %v3874_v2  ;;  %s775_s5 = scalar_lea.vmem %s5185_s0, %s4156_s26  ;;  %s5186_s26 = sld [smem:[#allocation25_spill]] }
  0x40   : > { %849 = vmatpush1.msra.mxu0 %v2999_v27  ;;  %922 = vmatpush1.msra.mxu1 %v780_v28 }
  0x41   : > { %850 = vmatprep.subr.mxu0 %v3874_v2  ;;  %923 = vmatprep.subr.mxu1 %v3874_v2 }
  0x42   : > { %851 = vmatpush1.msra.mxu0 %v2998_v29  ;;  %924 = vmatpush1.msra.mxu1 %v779_v30 }
  0x43   : > { %852 = vmatprep.subr.mxu0 %v3874_v2  ;;  %925 = vmatprep.subr.mxu1 %v3874_v2 }
  0x44   : > { %853 = vmatpush1.msra.mxu0 %v2997_v31  ;;  %926 = vmatpush1.msra.mxu1 %v778_v32 }
  0x45   : > { %882 = vmatprep.subr.mxu0 %v3874_v2  ;;  %955 = vmatprep.subr.mxu1 %v3874_v2 }
  0x46   : > { %883 = vmatpush2.msra.mxu0 %v3014_v35  ;;  %956 = vmatpush2.msra.mxu1 %v795_v36 }
  0x47   : > { %884 = vmatprep.subr.mxu0 %v3874_v2  ;;  %3015 = vmatprep.mubr.msk.f32.mxu0 %vm818_vm0, %v2996_v37  ;;  %v3048_v37 = vld [vmem:[%s5178_s25 + $0x98] sm:$0xff] }
  0x48   : > { %885 = vmatpush2.msra.mxu0 %v3013_v38  ;;  %957 = vmatprep.subr.mxu1 %v3874_v2  ;;  %v1304_v38 = vld [vmem:[%s5178_s25 + $0x48] sm:$0xff] }
  0x49   : > { %887 = vmatmul.mubr.f32.vlgmr.msra.gmra.mxu0 %v2995_v41  ;;  %958 = vmatpush2.msra.mxu1 %v794_v42  ;;  %v3046_v41 = vld [vmem:[%s5178_s25 + $0x88] sm:$0xff]  ;;  %v1302_v42 = vld [vmem:[%s5178_s25 + $0x38] sm:$0xff] }
  0x4a   : > { %3016 = vmatprep.mubr.msk.f32.mxu1 %vm818_vm0, %v777_v43  ;;  %1002 = vmatprep.subr.mxu0 %v3874_v2  ;;  %v3045_v43 = vld [vmem:[%s5178_s25 + $0x80] sm:$0xff] }
  0x4b   : > { %960 = vmatmul.mubr.f32.vlgmr.msra.gmra.mxu1 %v776_v44  ;;  %1003 = vmatpush1.msra.mxu0 %v3032_v45  ;;  %v1301_v44 = vld [vmem:[%s5178_s25 + $0x30] sm:$0xff]  ;;  %v3044_v45 = vld [vmem:[%s5178_s25 + $0x78] sm:$0xff] }
  0x4c   : > { %1004 = vmatprep.subr.mxu0 %v3874_v2  ;;  %3035 = vmatprep.mubr.msk.f32.mxu0 %vm818_vm0, %v998_v46  ;;  %v1300_v46 = vld [vmem:[%s5178_s25 + $0x28] sm:$0xff]  ;;  %vm1747_vm0 = vcmask 780288  }
  0x4d   : > { %1005 = vmatpush1.msra.mxu0 %v3031_v47  ;;  %3338 = vmatprep.subr.mxu1 %v3874_v2  ;;  %v3043_v47 = vld [vmem:[%s5178_s25 + $0x70] sm:$0xff]  ;;  %1748 = vst.msk [vmem:[#allocation3] sm:$0x7] %vm1747_vm0, %v3874_v2  ;;  %1749 = vst.msk [vmem:[#allocation3 + $0x4] sm:$0x7] %vm1747_vm0, %v3874_v2 }
  0x4e   : > { %1006 = vmatprep.subr.mxu0 %v3874_v2  ;;  %3339 = vmatpush3.msra.mxu1 %v1096_v6 }
  0x4f   : > { %1007 = vmatpush1.msra.mxu0 %v3030_v48  ;;  %3340 = vmatprep.subr.mxu1 %v3874_v2  ;;  %v1299_v48 = vld [vmem:[%s5178_s25 + $0x20] sm:$0xff] }
  0x50   : > { %1008 = vmatprep.subr.mxu0 %v3874_v2  ;;  %3341 = vmatpush3.msra.mxu1 %v1095_v7 }
  0x51   : > { %1009 = vmatpush1.msra.mxu0 %v3029_v49  ;;  %3342 = vmatprep.subr.mxu1 %v3874_v2 }
  0x52   : > { %1010 = vmatprep.subr.mxu0 %v3874_v2  ;;  %3343 = vmatpush3.msra.mxu1 %v1094_v8 }
  0x53   : > { %1011 = vmatpush1.msra.mxu0 %v3028_v50  ;;  %3344 = vmatprep.subr.mxu1 %v3874_v2 }
  0x54   : > { %1012 = vmatprep.subr.mxu0 %v3874_v2  ;;  %3345 = vmatpush3.msra.mxu1 %v1093_v9 }
  0x55   : > { %1013 = vmatpush1.msra.mxu0 %v3027_v51  ;;  %3346 = vmatprep.subr.mxu1 %v3874_v2 }
  0x56   : > { %1014 = vmatprep.subr.mxu0 %v3874_v2  ;;  %3347 = vmatpush3.msra.mxu1 %v1092_v10 }
  0x57   : > { %1015 = vmatpush1.msra.mxu0 %v3026_v52  ;;  %3348 = vmatprep.subr.mxu1 %v3874_v2 }
  0x58   : > { %1016 = vmatprep.subr.mxu0 %v3874_v2  ;;  %3349 = vmatpush3.msra.mxu1 %v1091_v11 }
  0x59   : > { %1017 = vmatpush1.msra.mxu0 %v3025_v53  ;;  %3350 = vmatprep.subr.mxu1 %v3874_v2 }
  0x5a   : > { %1018 = vmatprep.subr.mxu0 %v3874_v2  ;;  %3351 = vmatpush3.msra.mxu1 %v1090_v12 }
  0x5b   : > { %1019 = vmatpush1.msra.mxu0 %v3024_v54  ;;  %3352 = vmatprep.subr.mxu1 %v3874_v2 }
  0x5c   : > { %1020 = vmatprep.subr.mxu0 %v3874_v2  ;;  %3353 = vmatpush3.msra.mxu1 %v1089_v13 }
  0x5d   : > { %1021 = vmatpush1.msra.mxu0 %v3023_v55  ;;  %3354 = vmatprep.mubr.msk.f32.mxu1 %vm3875_vm2, %v3874_v2 }
  0x5e   : > { %1022 = vmatprep.subr.mxu0 %v3874_v2  ;;  %3357 = vmatprep.subr.mxu1 %v3874_v2 }
  0x5f   : > { %1023 = vmatpush1.msra.mxu0 %v3022_v56  ;;  %v1245_v56 = vlaneseq }
  0x60   : > { %1024 = vmatprep.subr.mxu0 %v3874_v2 }
  0x61   : > { %1025 = vmatpush1.msra.mxu0 %v3021_v57  ;;  %v1246_v57 = vshrl.u32 %v1245_v56, 7 }
  0x62   : > { %1026 = vmatprep.subr.mxu0 %v3874_v2 }
  0x63   : > { %1027 = vmatpush1.msra.mxu0 %v3020_v58  ;;  %v4408_v58 = vsub.s32 0, %v1246_v57 }
  0x64   : > { %1028 = vmatprep.subr.mxu0 %v3874_v2 }
  0x65   : > { %1029 = vmatpush1.msra.mxu0 %v3019_v59  ;;  %v1252_v59 = vld [vmem:[%s5179_s3] sm:$0x1] }
  0x66   : > { %1030 = vmatprep.subr.mxu0 %v3874_v2 }
  0x67   : > { %1031 = vmatpush1.msra.mxu0 %v3018_v60  ;;  %v3042_v60 = vld [vmem:[%s5178_s25 + $0x68] sm:$0xff] }
  0x68   : > { %1032 = vmatprep.subr.mxu0 %v3874_v2 }
  0x69   : > { %1033 = vmatpush1.msra.mxu0 %v3017_v63  ;;  %v3041_v63 = vld [vmem:[%s5178_s25 + $0x60] sm:$0xff] }
  0x6a   : > { %1062 = vmatprep.subr.mxu0 %v3874_v2 }
  0x6b   : > { %1063 = vmatpush2.msra.mxu0 %v3034_v3  ;;  %v3040_v3 = vld [vmem:[%s5178_s25 + $0x58] sm:$0xff] }
  0x6c   : > { %1064 = vmatprep.subr.mxu0 %v3874_v2 }
  0x6d   : > { %1065 = vmatpush2.msra.mxu0 %v3033_v4 }
  0x6e   : > { %1067 = vmatmul.mubr.f32.vlgmr.msra.gmra.mxu0 %v995_v5  ;;  %3399 = vmatprep.subr.mxu0 %v3874_v2  ;;  %v1296_v5 = vld [vmem:[%s5178_s25 + $0x8] sm:$0xff] }
  0x6f   : > { %3419 = vmatprep.mubr.msk.f32.mxu0 %vm3875_vm2, %v3874_v2  ;;  %3400 = vmatpush3.msra.mxu0 %v1304_v38 }
  0x70   : > { %3401 = vmatprep.subr.mxu0 %v3874_v2 }
  0x71   : > { %3402 = vmatpush3.msra.mxu0 %v1303_v40 }
  0x72   : > { %3403 = vmatprep.subr.mxu0 %v3874_v2 }
  0x73   : > { %3404 = vmatpush3.msra.mxu0 %v1302_v42 }
  0x74   : > { %3405 = vmatprep.subr.mxu0 %v3874_v2 }
  0x75   : > { %3406 = vmatpush3.msra.mxu0 %v1301_v44 }
  0x76   : > { %3407 = vmatprep.subr.mxu0 %v3874_v2 }
  0x77   : > { %3408 = vmatpush3.msra.mxu0 %v1300_v46 }
  0x78   : > { %3409 = vmatprep.subr.mxu0 %v3874_v2 }
  0x79   : > { %3410 = vmatpush3.msra.mxu0 %v1299_v48 }
  0x7a   : > { %3411 = vmatprep.subr.mxu0 %v3874_v2 }
  0x7b   : > { %3412 = vmatpush3.msra.mxu0 %v1298_v62  ;;  %v1775_v62 = vld [vmem:[%s5182_s10 + $0x58] sm:$0xff] }
  0x7c   : > { %3413 = vmatprep.subr.mxu0 %v3874_v2 }
  0x7d   : > { %3414 = vmatpush3.msra.mxu0 %v1297_v0  ;;  %v1774_v0 = vld [vmem:[%s5182_s10 + $0x50] sm:$0xff] }
  0x7e   : > { %3415 = vmatprep.subr.mxu0 %v3874_v2 }
  0x7f   : > { %3416 = vmatpush3.msra.mxu0 %v1296_v5  ;;  %v1772_v5 = vld [vmem:[%s5182_s10 + $0x40] sm:$0xff] }
  0x80   : > { %3417 = vmatprep.subr.mxu0 %v3874_v2 }
 0x109   : > { %v888_v14 = vpop.f32.mrf.mxu0 }
 0x10b   : > { %v961_v15 = vpop.f32.mrf.mxu1  ;;  %v890_v16 = vpop.f32.mrf.mxu0 }
 0x10c   : > { %v962_v18 = vadd.f32 %v961_v15, %v888_v14  ;;  %v3060_v16 = vld [vmem:[%s5178_s25 + $0xe8] sm:$0xff] }
 0x10d   : > { %v963_v17 = vpop.f32.mrf.mxu1 }
 0x12e   : > { %v1068_v19 = vpop.f32.mrf.mxu0 }
 0x12f   : > { %v4337_v20 = vadd.f32 %v1068_v19, %v962_v18  ;;  %v3059_v19 = vld [vmem:[%s5178_s25 + $0xe0] sm:$0xff] }
 0x130   : > { %v1070_v21 = vpop.f32.mrf.mxu0 }
 0x131   : > { %v1074_v22 = vsel %vm1073_vm3, %v4337_v20, 0.0  ;;  %v1081_v23 = vmul.f32 %v4337_v20, %v4337_v20  ;;  %v3057_v21 = vld [vmem:[%s5178_s25 + $0xd0] sm:$0xff] }
 0x132   : > { %v1075_v24 = vrot.slane %v1074_v22, 4 }
 0x133   : > { %v1082_v26 = vsel %vm1073_vm3, %v1081_v23, 0.0  ;;  %v3055_v23 = vld [vmem:[%s5178_s25 + $0xc0] sm:$0xff] }
 0x134   : > { %v1076_v25 = vadd.f32 %v1075_v24, %v1074_v22  ;;  %v1083_v29 = vrot.slane %v1082_v26, 4  ;;  %v3056_v22 = vld [vmem:[%s5178_s25 + $0xc8] sm:$0xff]  ;;  %v3054_v24 = vld [vmem:[%s5178_s25 + $0xb8] sm:$0xff] }
 0x136   : > { %v1077_v27 = vrot.slane %v1076_v25, 2  ;;  %v1084_v32 = vadd.f32 %v1083_v29, %v1082_v26  ;;  %v3052_v26 = vld [vmem:[%s5178_s25 + $0xa8] sm:$0xff]  ;;  %v1573_v29 = vld [vmem:[%s5181_s8 + $0x38] sm:$0xff] }
 0x138   : > { %v1078_v28 = vadd.f32 %v1077_v27, %v1076_v25  ;;  %v1085_v33 = vrot.slane %v1084_v32, 2  ;;  %v3053_v25 = vld [vmem:[%s5178_s25 + $0xb0] sm:$0xff]  ;;  %v3051_v27 = vld [vmem:[%s5178_s25 + $0xa0] sm:$0xff] }
 0x13a   : > { %v1079_v30 = vrot.slane %v1078_v28, 1  ;;  %v1086_v34 = vadd.f32 %v1085_v33, %v1084_v32  ;;  %v1570_v32 = vld [vmem:[%s5181_s8 + $0x20] sm:$0xff]  ;;  %v1569_v33 = vld [vmem:[%s5181_s8 + $0x18] sm:$0xff] }
 0x13c   : > { %v1080_v31 = vadd.f32 %v1079_v30, %v1078_v28  ;;  %v1087_v35 = vrot.slane %v1086_v34, 1  ;;  %v1572_v30 = vld [vmem:[%s5181_s8 + $0x30] sm:$0xff] }
 0x13e   : > { %3355 = vmatmul.mubr.msk.f32.vlgmr.msra.gmra.mxu1 %vm1073_vm3, %v1080_v31  ;;  %v1088_v36 = vadd.f32 %v1087_v35, %v1086_v34  ;;  %v1571_v31 = vld [vmem:[%s5181_s8 + $0x28] sm:$0xff]  ;;  %v1568_v34 = vld [vmem:[%s5181_s8 + $0x10] sm:$0xff] }
 0x13f   : > { %3358 = vmatpush3.msra.mxu1 %v1096_v6  ;;  %3373 = vmatprep.mubr.msk.f32.mxu1 %vm3875_vm2, %v3874_v2  ;;  %v3039_v6 = vld [vmem:[%s5178_s25 + $0x50] sm:$0xff]  ;;  %v1567_v35 = vld [vmem:[%s5181_s8 + $0x8] sm:$0xff] }
 0x140   : > { %3359 = vmatprep.subr.mxu1 %v3874_v2 }
 0x141   : > { %3360 = vmatpush3.msra.mxu1 %v1095_v7 }
 0x142   : > { %3361 = vmatprep.subr.mxu1 %v3874_v2 }
 0x143   : > { %3362 = vmatpush3.msra.mxu1 %v1094_v8 }
 0x144   : > { %3363 = vmatprep.subr.mxu1 %v3874_v2 }
 0x145   : > { %3364 = vmatpush3.msra.mxu1 %v1093_v9  ;;  %v1295_v9 = vld [vmem:[%s5178_s25] sm:$0xff] }
 0x146   : > { %3365 = vmatprep.subr.mxu1 %v3874_v2  ;;  %3418 = vmatpush3.msra.mxu0 %v1295_v9  ;;  %v1770_v9 = vld [vmem:[%s5182_s10 + $0x30] sm:$0xff] }
 0x147   : > { %3366 = vmatpush3.msra.mxu1 %v1092_v10  ;;  %v3038_v10 = vld [vmem:[%s5180_s1] ss:$0 sm:$0xff]  ;;  %3445 = vmatprep.subr.mxu0 %v3874_v2  ;;  %s5183_s1 = sld [smem:[#allocation21_spill]] }
 0x148   : > { %3367 = vmatprep.subr.mxu1 %v3874_v2 }
 0x149   : > { %3368 = vmatpush3.msra.mxu1 %v1091_v11 }
 0x14a   : > { %3369 = vmatprep.subr.mxu1 %v3874_v2 }
 0x14b   : > { %3370 = vmatpush3.msra.mxu1 %v1090_v12 }
 0x14c   : > { %3371 = vmatprep.subr.mxu1 %v3874_v2 }
 0x14d   : > { %3372 = vmatpush3.msra.mxu1 %v1089_v13 }
 0x14e   : > { %3374 = vmatmul.mubr.msk.f32.vlgmr.msra.gmra.mxu1 %vm1073_vm3, %v1088_v36  ;;  %3376 = vmatprep.subr.mxu1 %v3874_v2  ;;  %v1566_v36 = vld [vmem:[%s5181_s8] sm:$0xff]  ;;  %s3879_s8 = smov [#allocation5]  }
 0x14f   : > { %3396 = vmatprep.mubr.msk.f32.mxu1 %vm3875_vm2, %v3874_v2  ;;  %3377 = vmatpush3.msra.mxu1 %v3048_v37  ;;  %s3816_s3 = sshll.u32 %s3879_s8, 4  ;;  %s3817_s3 = int_to_ptr.vmem [resolvable:$false] %s3816_s3 }
 0x150   : > { %3378 = vmatprep.subr.mxu1 %v3874_v2  ;;  %s3818_s7 = scalar_lea.vmem %s3817_s3, 32 }
 0x151   : > { %3379 = vmatpush3.msra.mxu1 %v3047_v39 }
 0x152   : > { %3380 = vmatprep.subr.mxu1 %v3874_v2 }
 0x153   : > { %3381 = vmatpush3.msra.mxu1 %v3046_v41 }
 0x154   : > { %3382 = vmatprep.subr.mxu1 %v3874_v2 }
 0x155   : > { %3383 = vmatpush3.msra.mxu1 %v3045_v43 }
 0x156   : > { %3384 = vmatprep.subr.mxu1 %v3874_v2 }
 0x157   : > { %3385 = vmatpush3.msra.mxu1 %v3044_v45 }
 0x158   : > { %3386 = vmatprep.subr.mxu1 %v3874_v2 }
 0x159   : > { %3387 = vmatpush3.msra.mxu1 %v3043_v47 }
 0x15a   : > { %3388 = vmatprep.subr.mxu1 %v3874_v2 }
 0x15b   : > { %3389 = vmatpush3.msra.mxu1 %v3042_v60 }
 0x15c   : > { %3390 = vmatprep.subr.mxu1 %v3874_v2 }
 0x15d   : > { %3391 = vmatpush3.msra.mxu1 %v3041_v63  ;;  %v3075_v63 = vld [vmem:[%s5182_s10 + $0xb0] sm:$0xff] }
 0x15e   : > { %3392 = vmatprep.subr.mxu1 %v3874_v2 }
 0x15f   : > { %3393 = vmatpush3.msra.mxu1 %v3040_v3  ;;  %v1773_v3 = vld [vmem:[%s5182_s10 + $0x48] sm:$0xff] }
 0x160   : > { %3394 = vmatprep.subr.mxu1 %v3874_v2 }
 0x161   : > { %3395 = vmatpush3.msra.mxu1 %v3039_v6  ;;  %v3072_v6 = vld [vmem:[%s5182_s10 + $0x98] sm:$0xff] }
 0x162   : > { %3422 = vmatprep.subr.mxu1 %v3874_v2 }
 0x1fe   : > { %v1166_v49 = vpop.f32.mrf.mxu1 }
 0x1ff   : > { %v1243_v51 = vmul.f32 %v1166_v49, %v1166_v49  ;;  %v1248_v61 = vrot.slane %v1166_v49, %v4408_v58 }
 0x200   : > { %v3356_v50 = vpop.f32.mrf.mxu1 }
 0x201   : > { %v1249_v7 = vsub.f32 %v4337_v20, %v1248_v61  ;;  %v3058_v20 = vld [vmem:[%s5178_s25 + $0xd8] sm:$0xff] }
 0x202   : > { %v3076_v61 = vld [vmem:[%s5182_s10 + $0xb8] sm:$0xff] }
 0x20e   : > { %v1239_v52 = vpop.f32.mrf.mxu1 }
 0x20f   : > { %v1244_v53 = vsub.f32 %v1239_v52, %v1243_v51 }
 0x210   : > { %v3375_v54 = vpop.f32.mrf.mxu1 }
 0x211   : > { %v1250_v55 = vadd.f32 1e-05, %v1244_v53 }
 0x213   : > { %3806 = vrsqrt.f32 %v1250_v55 }
 0x220   : > { %v3807_v1 = vpop.eup %3806 }
 0x221   : > { %v1253_v4 = vmul.f32 %v3807_v1, %v1252_v59  ;;  %v3074_v1 = vld [vmem:[%s5182_s10 + $0xa8] sm:$0xff] }
 0x223   : > { %v1257_v8 = vrot.slane %v1253_v4, %v4408_v58  ;;  %v3073_v4 = vld [vmem:[%s5182_s10 + $0xa0] sm:$0xff] }
 0x225   : > { %v1258_v11 = vmul.f32 %v1257_v8, %v1249_v7  ;;  %v1771_v7 = vld [vmem:[%s5182_s10 + $0x38] sm:$0xff]  ;;  %v3071_v8 = vld [vmem:[%s5182_s10 + $0x90] sm:$0xff] }
 0x227   : > { %v1266_v12 = vadd.f32 %v3038_v10, %v1258_v11  ;;  %v3070_v10 = vld [vmem:[%s5182_s10 + $0x88] sm:$0xff] }
 0x228   : > { %v1769_v11 = vld [vmem:[%s5182_s10 + $0x28] sm:$0xff] }
 0x229   : > { %vm1267_vm5 = vcmp.ge.f32.partialorder %v1266_v12, 0.0  ;;  %v1268_v13 = vmul.f32 0.2, %v1266_v12 }
 0x22b   : > { %v1269_v14 = vsel %vm1267_vm5, %v1266_v12, %v1268_v13  ;;  %v3069_v12 = vld [vmem:[%s5182_s10 + $0x80] sm:$0xff]  ;;  %vm1757_vm5 = vcmask 648321  }
 0x22c   : > { %1274 = vrot.lane.b32.xlu0 %v1269_v14, %s3876_s9  ;;  %v1768_v13 = vld [vmem:[%s5182_s10 + $0x20] sm:$0xff]  ;;  %s766_s9 = sand.u32 1, %s3864_s2  }
 0x22d   : > { %s767_s0 = scalar_lea.vmem [#allocation5], %s766_s9  ;;  %s2913_s30 = scalar_lea.sflag [#allocation6], %s766_s9 }
 0x29e   : > { %v1275_v15 = vpop.permute.xlu0 %1274 }
 0x29f   : > { %1279 = vst.msk [vmem:[#allocation2 + $0x8] sm:$0x1] %vm1278_vm6, %v1275_v15  ;;  %vm1759_vm6 = vcmask 649346  }
 0x2a0   : > { %1281 = vst.msk [vmem:[#allocation2] sm:$0x2] %vm1280_vm7, %v1275_v15  ;;  %vm1761_vm7 = vcmask 650371  }
 0x2a1   : > { %1283 = vst.msk [vmem:[#allocation2 + $0x7] sm:$0x4] %vm1282_vm8, %v1275_v15  ;;  %vm1790_vm8 = vcmask 785408  }
 0x2a2   : > { %1285 = vst.msk [vmem:[#allocation2 - $0x1] sm:$0x8] %vm1284_vm9, %v1275_v15  ;;  %vm2025_vm9 = vcmask 517120  }
 0x2a3   : > { %1287 = vst.msk [vmem:[#allocation2 + $0x6] sm:$0x10] %vm1286_vm10, %v1275_v15  ;;  %vm2229_vm10 = vcmask 778496  }
 0x2a4   : > { %1289 = vst.msk [vmem:[#allocation2 - $0x2] sm:$0x20] %vm1288_vm11, %v1275_v15  ;;  %vm2231_vm11 = vcmask 779521  }
 0x2a5   : > { %1291 = vst.msk [vmem:[#allocation2 + $0x5] sm:$0x40] %vm1290_vm12, %v1275_v15  ;;  %vm2511_vm12 = vcmask 261120  }
 0x2a6   : > { %1293 = vst.msk [vmem:[#allocation2 - $0x3] sm:$0x80] %vm1292_vm13, %v1275_v15 }
 0x2ab   : > { %v1294_v18 = vld [vmem:[#allocation2] sm:$0xf] }
 0x2ac   : > { %v1305_v17 = vld [vmem:[#allocation2 + $0x8] sm:$0xf]  ;;  %3420 = vmatmul.mubr.msk.f32.vlgmr.msra.gmra.mxu0 %vm1317_vm14, %v1294_v18 }
 0x2ad   : > { %3397 = vmatmul.mubr.msk.f32.vlgmr.msra.gmra.mxu1 %vm1317_vm14, %v1305_v17  ;;  %3461 = vmatprep.mubr.msk.f32.mxu0 %vm3875_vm2, %v3874_v2  ;;  %v1464_v28 = vld [vmem:[#allocation2 + $0x1] sm:$0xf] }
 0x2ae   : > { %3423 = vmatpush3.msra.mxu1 %v3060_v16  ;;  %3442 = vmatprep.mubr.msk.f32.mxu1 %vm3875_vm2, %v3874_v2 }
 0x2af   : > { %3424 = vmatprep.subr.mxu1 %v3874_v2  ;;  %3446 = vmatpush3.msra.mxu0 %v1573_v29 }
 0x2b0   : > { %3425 = vmatpush3.msra.mxu1 %v3059_v19  ;;  %3447 = vmatprep.subr.mxu0 %v3874_v2 }
 0x2b1   : > { %3426 = vmatprep.subr.mxu1 %v3874_v2  ;;  %3448 = vmatpush3.msra.mxu0 %v1572_v30 }
 0x2b2   : > { %3427 = vmatpush3.msra.mxu1 %v3058_v20  ;;  %3449 = vmatprep.subr.mxu0 %v3874_v2 }
 0x2b3   : > { %3428 = vmatprep.subr.mxu1 %v3874_v2  ;;  %3450 = vmatpush3.msra.mxu0 %v1571_v31 }
 0x2b4   : > { %3429 = vmatpush3.msra.mxu1 %v3057_v21  ;;  %3451 = vmatprep.subr.mxu0 %v3874_v2  ;;  %v1729_v21 = vld [vmem:[%s5183_s1] sm:$0x1] }
 0x2b5   : > { %3430 = vmatprep.subr.mxu1 %v3874_v2  ;;  %3452 = vmatpush3.msra.mxu0 %v1570_v32 }
 0x2b6   : > { %3431 = vmatpush3.msra.mxu1 %v3056_v22  ;;  %3453 = vmatprep.subr.mxu0 %v3874_v2  ;;  %v3068_v22 = vld [vmem:[%s5182_s10 + $0x78] sm:$0xff] }
 0x2b7   : > { %3432 = vmatprep.subr.mxu1 %v3874_v2  ;;  %3454 = vmatpush3.msra.mxu0 %v1569_v33 }
 0x2b8   : > { %3433 = vmatpush3.msra.mxu1 %v3055_v23  ;;  %3455 = vmatprep.subr.mxu0 %v3874_v2 }
 0x2b9   : > { %3434 = vmatprep.subr.mxu1 %v3874_v2  ;;  %3456 = vmatpush3.msra.mxu0 %v1568_v34 }
 0x2ba   : > { %3435 = vmatpush3.msra.mxu1 %v3054_v24  ;;  %3457 = vmatprep.subr.mxu0 %v3874_v2  ;;  %v1767_v24 = vld [vmem:[%s5182_s10 + $0x18] sm:$0xff] }
 0x2bb   : > { %3436 = vmatprep.subr.mxu1 %v3874_v2  ;;  %3458 = vmatpush3.msra.mxu0 %v1567_v35 }
 0x2bc   : > { %3437 = vmatpush3.msra.mxu1 %v3053_v25  ;;  %3459 = vmatprep.subr.mxu0 %v3874_v2  ;;  %v3067_v25 = vld [vmem:[%s5182_s10 + $0x70] sm:$0xff] }
 0x2bd   : > { %3438 = vmatprep.subr.mxu1 %v3874_v2  ;;  %3460 = vmatpush3.msra.mxu0 %v1566_v36 }
 0x2be   : > { %3439 = vmatpush3.msra.mxu1 %v3052_v26  ;;  %3464 = vmatprep.subr.mxu0 %v3874_v2  ;;  %v1766_v26 = vld [vmem:[%s5182_s10 + $0x10] sm:$0xff] }
 0x2bf   : > { %3440 = vmatprep.subr.mxu1 %v3874_v2 }
 0x2c0   : > { %3441 = vmatpush3.msra.mxu1 %v3051_v27 }
 0x2c1   : > { %3443 = vmatmul.mubr.msk.f32.vlgmr.msra.gmra.mxu1 %vm1317_vm14, %v1464_v28  ;;  %3483 = vmatprep.subr.mxu1 %v3874_v2  ;;  %v3066_v28 = vld [vmem:[%s5182_s10 + $0x68] sm:$0xff] }
 0x2c2   : > { %3507 = vmatprep.mubr.msk.f32.mxu1 %vm3875_vm2, %v3874_v2  ;;  %3484 = vmatpush3.msra.mxu1 %v3076_v61  ;;  %v2044_v61 = vld [vmem:[%s5128_s13 + $0x18] sm:$0xff] }
 0x2c3   : > { %3485 = vmatprep.subr.mxu1 %v3874_v2 }
 0x2c4   : > { %3486 = vmatpush3.msra.mxu1 %v3075_v63  ;;  %v2042_v63 = vld [vmem:[%s5128_s13 + $0x8] sm:$0xff] }
 0x2c5   : > { %3487 = vmatprep.subr.mxu1 %v3874_v2 }
 0x2c6   : > { %3488 = vmatpush3.msra.mxu1 %v3074_v1 }
 0x2c7   : > { %3489 = vmatprep.subr.mxu1 %v3874_v2 }
 0x2c8   : > { %3490 = vmatpush3.msra.mxu1 %v3073_v4 }
 0x2c9   : > { %3491 = vmatprep.subr.mxu1 %v3874_v2 }
 0x2ca   : > { %3492 = vmatpush3.msra.mxu1 %v3072_v6 }
 0x2cb   : > { %3493 = vmatprep.subr.mxu1 %v3874_v2 }
 0x2cc   : > { %3494 = vmatpush3.msra.mxu1 %v3071_v8 }
 0x2cd   : > { %3495 = vmatprep.subr.mxu1 %v3874_v2 }
 0x2ce   : > { %3496 = vmatpush3.msra.mxu1 %v3070_v10 }
 0x2cf   : > { %3497 = vmatprep.subr.mxu1 %v3874_v2 }
 0x2d0   : > { %3498 = vmatpush3.msra.mxu1 %v3069_v12 }
 0x2d1   : > { %3499 = vmatprep.subr.mxu1 %v3874_v2 }
 0x2d2   : > { %3500 = vmatpush3.msra.mxu1 %v3068_v22 }
 0x2d3   : > { %3501 = vmatprep.subr.mxu1 %v3874_v2 }
 0x2d4   : > { %3502 = vmatpush3.msra.mxu1 %v3067_v25  ;;  %v3110_v25 = vld [vmem:[%s5129_s14 + $0xf8] sm:$0xff] }
 0x2d5   : > { %3503 = vmatprep.subr.mxu1 %v3874_v2 }
 0x2d6   : > { %3504 = vmatpush3.msra.mxu1 %v3066_v28  ;;  %v2248_v28 = vld [vmem:[%s5129_s14 + $0x70] sm:$0xff] }
 0x2d7   : > { %3505 = vmatprep.subr.mxu1 %v3874_v2 }
 0x36c   : > { %v1460_v38 = vpop.f32.mrf.mxu0 }
 0x36d   : > { %v1387_v37 = vpop.f32.mrf.mxu1 }
 0x36e   : > { %v3421_v40 = vpop.f32.mrf.mxu0  ;;  %v1461_v41 = vadd.f32 %v1460_v38, %v1387_v37 }
 0x36f   : > { %v3398_v39 = vpop.f32.mrf.mxu1 }
 0x381   : > { %v1545_v42 = vpop.f32.mrf.mxu1 }
 0x382   : > { %v4532_v43 = vadd.f32 %v1545_v42, %v1461_v41  ;;  %v3090_v41 = vld [vmem:[%s5182_s10 + $0x118] sm:$0xff] }
 0x383   : > { %v3444_v44 = vpop.f32.mrf.mxu1 }
 0x384   : > { %v1551_v45 = vsel %vm1550_vm15, %v4532_v43, 0.0  ;;  %v1558_v46 = vmul.f32 %v4532_v43, %v4532_v43  ;;  %v3089_v44 = vld [vmem:[%s5182_s10 + $0x110] sm:$0xff] }
 0x385   : > { %v1552_v47 = vrot.slane %v1551_v45, 4 }
 0x386   : > { %v1559_v49 = vsel %vm1550_vm15, %v1558_v46, 0.0  ;;  %v3087_v46 = vld [vmem:[%s5182_s10 + $0x100] sm:$0xff] }
 0x387   : > { %v1553_v48 = vadd.f32 %v1552_v47, %v1551_v45  ;;  %v1560_v52 = vrot.slane %v1559_v49, 4  ;;  %v3088_v45 = vld [vmem:[%s5182_s10 + $0x108] sm:$0xff]  ;;  %v3086_v47 = vld [vmem:[%s5182_s10 + $0xf8] sm:$0xff] }
 0x389   : > { %v1554_v50 = vrot.slane %v1553_v48, 2  ;;  %v1561_v55 = vadd.f32 %v1560_v52, %v1559_v49  ;;  %v3084_v49 = vld [vmem:[%s5182_s10 + $0xe8] sm:$0xff]  ;;  %v3081_v52 = vld [vmem:[%s5182_s10 + $0xd0] sm:$0xff] }
 0x38b   : > { %v1555_v51 = vadd.f32 %v1554_v50, %v1553_v48  ;;  %v1562_v56 = vrot.slane %v1561_v55, 2  ;;  %v3085_v48 = vld [vmem:[%s5182_s10 + $0xf0] sm:$0xff]  ;;  %v3083_v50 = vld [vmem:[%s5182_s10 + $0xe0] sm:$0xff] }
 0x38d   : > { %v1556_v53 = vrot.slane %v1555_v51, 1  ;;  %v1563_v57 = vadd.f32 %v1562_v56, %v1561_v55  ;;  %v2048_v56 = vld [vmem:[%s5128_s13 + $0x38] sm:$0xff] }
 0x38f   : > { %v1557_v54 = vadd.f32 %v1556_v53, %v1555_v51  ;;  %v1564_v59 = vrot.slane %v1563_v57, 1  ;;  %v3082_v51 = vld [vmem:[%s5182_s10 + $0xd8] sm:$0xff]  ;;  %v3080_v53 = vld [vmem:[%s5182_s10 + $0xc8] sm:$0xff] }
 0x391   : > { %3462 = vmatmul.mubr.msk.f32.vlgmr.msra.gmra.mxu0 %vm1073_vm3, %v1557_v54  ;;  %v1565_v60 = vadd.f32 %v1564_v59, %v1563_v57  ;;  %v3079_v54 = vld [vmem:[%s5182_s10 + $0xc0] sm:$0xff]  ;;  %v2047_v57 = vld [vmem:[%s5128_s13 + $0x30] sm:$0xff]  ;;  %v2046_v59 = vld [vmem:[%s5128_s13 + $0x28] sm:$0xff] }
 0x392   : > { %3465 = vmatpush3.msra.mxu0 %v1573_v29  ;;  %3480 = vmatprep.mubr.msk.f32.mxu0 %vm3875_vm2, %v3874_v2 }
 0x393   : > { %3466 = vmatprep.subr.mxu0 %v3874_v2 }
 0x394   : > { %3467 = vmatpush3.msra.mxu0 %v1572_v30  ;;  %v1765_v30 = vld [vmem:[%s5182_s10 + $0x8] sm:$0xff] }
 0x395   : > { %3468 = vmatprep.subr.mxu0 %v3874_v2 }
 0x396   : > { %3469 = vmatpush3.msra.mxu0 %v1571_v31  ;;  %v3065_v31 = vld [vmem:[%s5182_s10 + $0x60] sm:$0xff] }
 0x397   : > { %3470 = vmatprep.subr.mxu0 %v3874_v2  ;;  %3506 = vmatpush3.msra.mxu1 %v3065_v31  ;;  %v3107_v31 = vld [vmem:[%s5129_s14 + $0xe0] sm:$0xff] }
 0x398   : > { %3471 = vmatpush3.msra.mxu0 %v1570_v32  ;;  %3537 = vmatprep.subr.mxu1 %v3874_v2 }
 0x399   : > { %3472 = vmatprep.subr.mxu0 %v3874_v2 }
 0x39a   : > { %3473 = vmatpush3.msra.mxu0 %v1569_v33 }
 0x39b   : > { %3474 = vmatprep.subr.mxu0 %v3874_v2 }
 0x39c   : > { %3475 = vmatpush3.msra.mxu0 %v1568_v34  ;;  %v1764_v34 = vld [vmem:[%s5182_s10] sm:$0xff] }
 0x39d   : > { %3476 = vmatprep.subr.mxu0 %v3874_v2 }
 0x39e   : > { %3477 = vmatpush3.msra.mxu0 %v1567_v35  ;;  %v3064_v35 = vld [vmem:[%s5184_s28] ss:$0 sm:$0xff]  ;;  %s3878_s28 = smov 32  }
 0x39f   : > { %3478 = vmatprep.subr.mxu0 %v3874_v2 }
 0x3a0   : > { %3479 = vmatpush3.msra.mxu0 %v1566_v36 }
 0x3a1   : > { %3481 = vmatmul.mubr.msk.f32.vlgmr.msra.gmra.mxu0 %vm1073_vm3, %v1565_v60  ;;  %3510 = vmatprep.subr.mxu0 %v3874_v2  ;;  %v2045_v60 = vld [vmem:[%s5128_s13 + $0x20] sm:$0xff] }
 0x3a2   : > { %3534 = vmatprep.mubr.msk.f32.mxu0 %vm3875_vm2, %v3874_v2  ;;  %3511 = vmatpush3.msra.mxu0 %v1775_v62  ;;  %v2043_v62 = vld [vmem:[%s5128_s13 + $0x10] sm:$0xff] }
 0x3a3   : > { %3512 = vmatprep.subr.mxu0 %v3874_v2 }
 0x3a4   : > { %3513 = vmatpush3.msra.mxu0 %v1774_v0  ;;  %v2041_v0 = vld [vmem:[%s5128_s13] sm:$0xff] }
 0x3a5   : > { %3514 = vmatprep.subr.mxu0 %v3874_v2 }
 0x3a6   : > { %3515 = vmatpush3.msra.mxu0 %v1773_v3 }
 0x3a7   : > { %3516 = vmatprep.subr.mxu0 %v3874_v2 }
 0x3a8   : > { %3517 = vmatpush3.msra.mxu0 %v1772_v5 }
 0x3a9   : > { %3518 = vmatprep.subr.mxu0 %v3874_v2 }
 0x3aa   : > { %3519 = vmatpush3.msra.mxu0 %v1771_v7 }
 0x3ab   : > { %3520 = vmatprep.subr.mxu0 %v3874_v2 }
 0x3ac   : > { %3521 = vmatpush3.msra.mxu0 %v1770_v9 }
 0x3ad   : > { %3522 = vmatprep.subr.mxu0 %v3874_v2 }
 0x3ae   : > { %3523 = vmatpush3.msra.mxu0 %v1769_v11 }
 0x3af   : > { %3524 = vmatprep.subr.mxu0 %v3874_v2 }
 0x3b0   : > { %3525 = vmatpush3.msra.mxu0 %v1768_v13 }
 0x3b1   : > { %3526 = vmatprep.subr.mxu0 %v3874_v2 }
 0x3b2   : > { %3527 = vmatpush3.msra.mxu0 %v1767_v24 }
 0x3b3   : > { %3528 = vmatprep.subr.mxu0 %v3874_v2 }
 0x3b4   : > { %3529 = vmatpush3.msra.mxu0 %v1766_v26  ;;  %v2249_v26 = vld [vmem:[%s5129_s14 + $0x78] sm:$0xff] }
 0x3b5   : > { %3530 = vmatprep.subr.mxu0 %v3874_v2 }
 0x3b6   : > { %3531 = vmatpush3.msra.mxu0 %v1765_v30  ;;  %v2247_v30 = vld [vmem:[%s5129_s14 + $0x68] sm:$0xff] }
 0x3b7   : > { %3532 = vmatprep.subr.mxu0 %v3874_v2 }
 0x3b8   : > { %3533 = vmatpush3.msra.mxu0 %v1764_v34  ;;  %v2245_v34 = vld [vmem:[%s5129_s14 + $0x58] sm:$0xff] }
 0x3b9   : > { %3564 = vmatprep.subr.mxu0 %v3874_v2 }
 0x451   : > { %v1643_v14 = vpop.f32.mrf.mxu0 }
 0x452   : > { %v1720_v16 = vmul.f32 %v1643_v14, %v1643_v14  ;;  %v1725_v23 = vrot.slane %v1643_v14, %v4408_v58 }
 0x453   : > { %v3463_v15 = vpop.f32.mrf.mxu0 }
 0x454   : > { %v1726_v32 = vsub.f32 %v4532_v43, %v1725_v23 }
 0x461   : > { %v1716_v17 = vpop.f32.mrf.mxu0 }
 0x462   : > { %v1721_v18 = vsub.f32 %v1716_v17, %v1720_v16 }
 0x463   : > { %v3482_v19 = vpop.f32.mrf.mxu0 }
 0x464   : > { %v1727_v20 = vadd.f32 1e-05, %v1721_v18 }
 0x466   : > { %3808 = vrsqrt.f32 %v1727_v20 }
 0x473   : > { %v3809_v27 = vpop.eup %3808 }
 0x474   : > { %v1730_v29 = vmul.f32 %v3809_v27, %v1729_v21  ;;  %v3109_v27 = vld [vmem:[%s5129_s14 + $0xf0] sm:$0xff] }
 0x476   : > { %v1734_v33 = vrot.slane %v1730_v29, %v4408_v58  ;;  %v3108_v29 = vld [vmem:[%s5129_s14 + $0xe8] sm:$0xff] }
 0x478   : > { %v1735_v36 = vmul.f32 %v1734_v33, %v1726_v32  ;;  %v2246_v32 = vld [vmem:[%s5129_s14 + $0x60] sm:$0xff]  ;;  %v3106_v33 = vld [vmem:[%s5129_s14 + $0xd8] sm:$0xff] }
 0x47a   : > { %v1743_v37 = vadd.f32 %v3064_v35, %v1735_v36  ;;  %v3105_v35 = vld [vmem:[%s5129_s14 + $0xd0] sm:$0xff] }
 0x47b   : > { %v2244_v36 = vld [vmem:[%s5129_s14 + $0x50] sm:$0xff] }
 0x47c   : > { %vm1744_vm1 = vcmp.ge.f32.partialorder %v1743_v37, 0.0  ;;  %v1745_v38 = vmul.f32 0.2, %v1743_v37 }
 0x47e   : > { %v1746_v39 = vsel %vm1744_vm1, %v1743_v37, %v1745_v38  ;;  %v3104_v37 = vld [vmem:[%s5129_s14 + $0xc8] sm:$0xff]  ;;  %vm2910_vm1 = vcmask 253952  }
 0x47f   : > { %1751 = vrot.lane.b32.xlu0 %v1746_v39, %s3877_s27  ;;  %v2243_v38 = vld [vmem:[%s5129_s14 + $0x48] sm:$0xff]  ;;  %v3103_v39 = vld [vmem:[%s5129_s14 + $0xc0] sm:$0xff]  ;;  %s2923_s27 = scalar_lea.hbm %s5186_s26, %s3132_s29 }
 0x4f1   : > { %v1752_v40 = vpop.permute.xlu0 %1751 }
 0x4f2   : > { %1756 = vst.msk [vmem:[#allocation3 + $0x4] sm:$0x1] %vm1755_vm4, %v1752_v40 }
 0x4f3   : > { %1758 = vst.msk [vmem:[#allocation3] sm:$0x2] %vm1757_vm5, %v1752_v40 }
 0x4f4   : > { %1760 = vst.msk [vmem:[#allocation3 + $0x3] sm:$0x4] %vm1759_vm6, %v1752_v40 }
 0x4f5   : > { %1762 = vst.msk [vmem:[#allocation3 - $0x1] sm:$0x8] %vm1761_vm7, %v1752_v40  ;;  %v2242_v40 = vld [vmem:[%s5129_s14 + $0x40] sm:$0xff] }
 0x4fa   : > { %v1763_v43 = vld [vmem:[#allocation3] sm:$0x3] }
 0x4fb   : > { %v1776_v42 = vld [vmem:[#allocation3 + $0x4] sm:$0x3]  ;;  %3535 = vmatmul.mubr.msk.f32.vlgmr.msra.gmra.mxu0 %vm1790_vm8, %v1763_v43 }
 0x4fc   : > { %3508 = vmatmul.mubr.msk.f32.vlgmr.msra.gmra.mxu1 %vm1790_vm8, %v1776_v42  ;;  %3580 = vmatprep.mubr.msk.f32.mxu0 %vm3875_vm2, %v3874_v2  ;;  %v1937_v55 = vld [vmem:[#allocation3 + $0x1] sm:$0x3]  ;;  %v2241_v42 = vld [vmem:[%s5129_s14 + $0x38] sm:$0xff] }
 0x4fd   : > { %3538 = vmatpush3.msra.mxu1 %v3090_v41  ;;  %3561 = vmatprep.mubr.msk.f32.mxu1 %vm3875_vm2, %v3874_v2  ;;  %v3102_v41 = vld [vmem:[%s5129_s14 + $0xb8] sm:$0xff]  ;;  %v3101_v43 = vld [vmem:[%s5129_s14 + $0xb0] sm:$0xff] }
 0x4fe   : > { %3539 = vmatprep.subr.mxu1 %v3874_v2  ;;  %3565 = vmatpush3.msra.mxu0 %v2048_v56 }
 0x4ff   : > { %3540 = vmatpush3.msra.mxu1 %v3089_v44  ;;  %3566 = vmatprep.subr.mxu0 %v3874_v2  ;;  %v2240_v44 = vld [vmem:[%s5129_s14 + $0x30] sm:$0xff] }
 0x500   : > { %3541 = vmatprep.subr.mxu1 %v3874_v2  ;;  %3567 = vmatpush3.msra.mxu0 %v2047_v57 }
 0x501   : > { %3542 = vmatpush3.msra.mxu1 %v3088_v45  ;;  %3568 = vmatprep.subr.mxu0 %v3874_v2  ;;  %v3100_v45 = vld [vmem:[%s5129_s14 + $0xa8] sm:$0xff] }
 0x502   : > { %3543 = vmatprep.subr.mxu1 %v3874_v2  ;;  %3569 = vmatpush3.msra.mxu0 %v2046_v59 }
 0x503   : > { %3544 = vmatpush3.msra.mxu1 %v3087_v46  ;;  %3570 = vmatprep.subr.mxu0 %v3874_v2  ;;  %v2239_v46 = vld [vmem:[%s5129_s14 + $0x28] sm:$0xff] }
 0x504   : > { %3545 = vmatprep.subr.mxu1 %v3874_v2  ;;  %3571 = vmatpush3.msra.mxu0 %v2045_v60 }
 0x505   : > { %3546 = vmatpush3.msra.mxu1 %v3086_v47  ;;  %3572 = vmatprep.subr.mxu0 %v3874_v2  ;;  %v3099_v47 = vld [vmem:[%s5129_s14 + $0xa0] sm:$0xff] }
 0x506   : > { %3547 = vmatprep.subr.mxu1 %v3874_v2  ;;  %3573 = vmatpush3.msra.mxu0 %v2044_v61 }
 0x507   : > { %3548 = vmatpush3.msra.mxu1 %v3085_v48  ;;  %3574 = vmatprep.subr.mxu0 %v3874_v2  ;;  %v2238_v48 = vld [vmem:[%s5129_s14 + $0x20] sm:$0xff] }
 0x508   : > { %3549 = vmatprep.subr.mxu1 %v3874_v2  ;;  %3575 = vmatpush3.msra.mxu0 %v2043_v62 }
 0x509   : > { %3550 = vmatpush3.msra.mxu1 %v3084_v49  ;;  %3576 = vmatprep.subr.mxu0 %v3874_v2 }
 0x50a   : > { %3551 = vmatprep.subr.mxu1 %v3874_v2  ;;  %3577 = vmatpush3.msra.mxu0 %v2042_v63 }
 0x50b   : > { %3552 = vmatpush3.msra.mxu1 %v3083_v50  ;;  %3578 = vmatprep.subr.mxu0 %v3874_v2 }
 0x50c   : > { %3553 = vmatprep.subr.mxu1 %v3874_v2  ;;  %3579 = vmatpush3.msra.mxu0 %v2041_v0 }
 0x50d   : > { %3554 = vmatpush3.msra.mxu1 %v3082_v51  ;;  %3602 = vmatprep.subr.mxu0 %v3874_v2 }
 0x50e   : > { %3555 = vmatprep.subr.mxu1 %v3874_v2 }
 0x50f   : > { %3556 = vmatpush3.msra.mxu1 %v3081_v52 }
 0x510   : > { %3557 = vmatprep.subr.mxu1 %v3874_v2 }
 0x511   : > { %3558 = vmatpush3.msra.mxu1 %v3080_v53 }
 0x512   : > { %3559 = vmatprep.subr.mxu1 %v3874_v2 }
 0x513   : > { %3560 = vmatpush3.msra.mxu1 %v3079_v54 }
 0x514   : > { %3562 = vmatmul.mubr.msk.f32.vlgmr.msra.gmra.mxu1 %vm1790_vm8, %v1937_v55  ;;  %3583 = vmatprep.subr.mxu1 %v3874_v2 }
 0x515   : > { %3599 = vmatprep.mubr.msk.f32.mxu1 %vm3875_vm2, %v3874_v2  ;;  %3584 = vmatpush3.msra.mxu1 %v2048_v56  ;;  %v2204_v56 = vld [vmem:[%s5126_s11] sm:$0x1] }
 0x516   : > { %3585 = vmatprep.subr.mxu1 %v3874_v2 }
 0x517   : > { %3586 = vmatpush3.msra.mxu1 %v2047_v57  ;;  %v3098_v57 = vld [vmem:[%s5129_s14 + $0x98] sm:$0xff] }
 0x518   : > { %3587 = vmatprep.subr.mxu1 %v3874_v2 }
 0x519   : > { %3588 = vmatpush3.msra.mxu1 %v2046_v59 }
 0x51a   : > { %3589 = vmatprep.subr.mxu1 %v3874_v2 }
 0x51b   : > { %3590 = vmatpush3.msra.mxu1 %v2045_v60  ;;  %v2237_v60 = vld [vmem:[%s5129_s14 + $0x18] sm:$0xff] }
 0x51c   : > { %3591 = vmatprep.subr.mxu1 %v3874_v2 }
 0x51d   : > { %3592 = vmatpush3.msra.mxu1 %v2044_v61  ;;  %v3097_v61 = vld [vmem:[%s5129_s14 + $0x90] sm:$0xff] }
 0x51e   : > { %3593 = vmatprep.subr.mxu1 %v3874_v2 }
 0x51f   : > { %3594 = vmatpush3.msra.mxu1 %v2043_v62  ;;  %v2236_v62 = vld [vmem:[%s5129_s14 + $0x10] sm:$0xff] }
 0x520   : > { %3595 = vmatprep.subr.mxu1 %v3874_v2 }
 0x521   : > { %3596 = vmatpush3.msra.mxu1 %v2042_v63 }
 0x522   : > { %3597 = vmatprep.subr.mxu1 %v3874_v2 }
 0x523   : > { %3598 = vmatpush3.msra.mxu1 %v2041_v0  ;;  %v3096_v0 = vld [vmem:[%s5129_s14 + $0x88] sm:$0xff] }
 0x524   : > { %3637 = vmatprep.subr.mxu1 %v3874_v2 }
 0x5bb   : > { %v1933_v3 = vpop.f32.mrf.mxu0 }
 0x5bc   : > { %v1860_v1 = vpop.f32.mrf.mxu1 }
 0x5bd   : > { %v3536_v5 = vpop.f32.mrf.mxu0  ;;  %v1934_v6 = vadd.f32 %v1933_v3, %v1860_v1  ;;  %v2235_v3 = vld [vmem:[%s5129_s14 + $0x8] sm:$0xff] }
 0x5be   : > { %v3509_v4 = vpop.f32.mrf.mxu1 }
 0x5bf   : > { %v3095_v4 = vld [vmem:[%s5129_s14 + $0x80] sm:$0xff] }
 0x5d4   : > { %v2020_v7 = vpop.f32.mrf.mxu1 }
 0x5d5   : > { %v4755_v8 = vadd.f32 %v2020_v7, %v1934_v6  ;;  %v2234_v7 = vld [vmem:[%s5129_s14] sm:$0xff] }
 0x5d6   : > { %v3563_v9 = vpop.f32.mrf.mxu1 }
 0x5d7   : > { %v2026_v10 = vsel %vm2025_vm9, %v4755_v8, 0.0  ;;  %v2033_v11 = vmul.f32 %v4755_v8, %v4755_v8  ;;  %v3094_v9 = vld [vmem:[%s5127_s12] ss:$0 sm:$0xff] }
 0x5d8   : > { %v2027_v12 = vrot.slane %v2026_v10, 4 }
 0x5d9   : > { %v2034_v13 = vsel %vm2025_vm9, %v2033_v11, 0.0 }
 0x5da   : > { %v2028_v14 = vadd.f32 %v2027_v12, %v2026_v10  ;;  %v2035_v15 = vrot.slane %v2034_v13, 4 }
 0x5dc   : > { %v2029_v16 = vrot.slane %v2028_v14, 2  ;;  %v2036_v17 = vadd.f32 %v2035_v15, %v2034_v13 }
 0x5de   : > { %v2030_v18 = vadd.f32 %v2029_v16, %v2028_v14  ;;  %v2037_v19 = vrot.slane %v2036_v17, 2  ;;  %v3126_v14 = vld [vmem:[%s5129_s14 + $0x178] sm:$0xff]  ;;  %v3125_v16 = vld [vmem:[%s5129_s14 + $0x170] sm:$0xff] }
 0x5e0   : > { %v2031_v20 = vrot.slane %v2030_v18, 1  ;;  %v2038_v21 = vadd.f32 %v2037_v19, %v2036_v17  ;;  %v3124_v17 = vld [vmem:[%s5129_s14 + $0x168] sm:$0xff]  ;;  %v3122_v19 = vld [vmem:[%s5129_s14 + $0x158] sm:$0xff] }
 0x5e2   : > { %v2032_v22 = vadd.f32 %v2031_v20, %v2030_v18  ;;  %v2039_v23 = vrot.slane %v2038_v21, 1  ;;  %v3123_v18 = vld [vmem:[%s5129_s14 + $0x160] sm:$0xff]  ;;  %v3121_v20 = vld [vmem:[%s5129_s14 + $0x150] sm:$0xff] }
 0x5e4   : > { %3581 = vmatmul.mubr.msk.f32.vlgmr.msra.gmra.mxu0 %vm1073_vm3, %v2032_v22  ;;  %v2040_v24 = vadd.f32 %v2039_v23, %v2038_v21  ;;  %v3120_v21 = vld [vmem:[%s5129_s14 + $0x148] sm:$0xff]  ;;  %v3119_v22 = vld [vmem:[%s5129_s14 + $0x140] sm:$0xff]  ;;  %v3118_v23 = vld [vmem:[%s5129_s14 + $0x138] sm:$0xff] }
 0x5e5   : > { %3634 = vmatprep.mubr.msk.f32.mxu0 %vm3875_vm2, %v3874_v2  ;;  %3603 = vmatpush3.msra.mxu0 %v3110_v25  ;;  %v3116_v25 = vld [vmem:[%s5129_s14 + $0x128] sm:$0xff] }
 0x5e6   : > { %3600 = vmatmul.mubr.msk.f32.vlgmr.msra.gmra.mxu1 %vm1073_vm3, %v2040_v24  ;;  %3604 = vmatprep.subr.mxu0 %v3874_v2  ;;  %v3117_v24 = vld [vmem:[%s5129_s14 + $0x130] sm:$0xff] }
 0x5e7   : > { %3669 = vmatprep.mubr.msk.f32.mxu1 %vm3875_vm2, %v3874_v2  ;;  %3638 = vmatpush3.msra.mxu1 %v2249_v26  ;;  %v3115_v26 = vld [vmem:[%s5129_s14 + $0x120] sm:$0xff] }
 0x5e8   : > { %3639 = vmatprep.subr.mxu1 %v3874_v2  ;;  %3605 = vmatpush3.msra.mxu0 %v3109_v27  ;;  %v3114_v27 = vld [vmem:[%s5129_s14 + $0x118] sm:$0xff] }
 0x5e9   : > { %3640 = vmatpush3.msra.mxu1 %v2248_v28  ;;  %3606 = vmatprep.subr.mxu0 %v3874_v2  ;;  %v3113_v28 = vld [vmem:[%s5129_s14 + $0x110] sm:$0xff] }
 0x5ea   : > { %3641 = vmatprep.subr.mxu1 %v3874_v2  ;;  %3607 = vmatpush3.msra.mxu0 %v3108_v29  ;;  %v3112_v29 = vld [vmem:[%s5129_s14 + $0x108] sm:$0xff] }
 0x5eb   : > { %3642 = vmatpush3.msra.mxu1 %v2247_v30  ;;  %3608 = vmatprep.subr.mxu0 %v3874_v2  ;;  %v3111_v30 = vld [vmem:[%s5129_s14 + $0x100] sm:$0xff] }
 0x5ec   : > { %3643 = vmatprep.subr.mxu1 %v3874_v2  ;;  %3609 = vmatpush3.msra.mxu0 %v3107_v31 }
 0x5ed   : > { %3644 = vmatpush3.msra.mxu1 %v2246_v32  ;;  %3610 = vmatprep.subr.mxu0 %v3874_v2 }
 0x5ee   : > { %3645 = vmatprep.subr.mxu1 %v3874_v2  ;;  %3611 = vmatpush3.msra.mxu0 %v3106_v33  ;;  %v2510_v33 = vld [vmem:[%s5132_s17 + $0x18] sm:$0xff] }
 0x5ef   : > { %3646 = vmatpush3.msra.mxu1 %v2245_v34  ;;  %3612 = vmatprep.subr.mxu0 %v3874_v2  ;;  %v2509_v34 = vld [vmem:[%s5132_s17 + $0x10] sm:$0xff] }
 0x5f0   : > { %3647 = vmatprep.subr.mxu1 %v3874_v2  ;;  %3613 = vmatpush3.msra.mxu0 %v3105_v35 }
 0x5f1   : > { %3648 = vmatpush3.msra.mxu1 %v2244_v36  ;;  %3614 = vmatprep.subr.mxu0 %v3874_v2  ;;  %v2508_v36 = vld [vmem:[%s5132_s17 + $0x8] sm:$0xff] }
 0x5f2   : > { %3649 = vmatprep.subr.mxu1 %v3874_v2  ;;  %3615 = vmatpush3.msra.mxu0 %v3104_v37  ;;  %v2507_v37 = vld [vmem:[%s5132_s17] sm:$0xff] }
 0x5f3   : > { %3650 = vmatpush3.msra.mxu1 %v2243_v38  ;;  %3616 = vmatprep.subr.mxu0 %v3874_v2  ;;  %v2502_v38 = vld [vmem:[%s775_s5] sm:$0x1]  ;;  %s2925_s5 = sshll.u32 %s767_s0, 4  ;;  %s2926_s5 = int_to_ptr.vmem [resolvable:$true] %s2925_s5 }
 0x5f4   : > { %3651 = vmatprep.subr.mxu1 %v3874_v2  ;;  %3617 = vmatpush3.msra.mxu0 %v3103_v39  ;;  %v2506_v39 = vld [vmem:[%s5131_s16 + $0x18] sm:$0xff]  ;;  %s3812_s1 = scalar_lea.vmem %s2926_s5, 16  ;;  %p3819_p0 = scmp.lt.s32.totalorder %s2926_s5, %s3817_s3 }
 0x5f5   : > { %3652 = vmatpush3.msra.mxu1 %v2242_v40  ;;  %3618 = vmatprep.subr.mxu0 %v3874_v2  ;;  %v2505_v40 = vld [vmem:[%s5131_s16 + $0x10] sm:$0xff]  ;;  %p3813_p11 = scmp.ne.s32.totalorder %s2926_s5, %s3812_s1  ;;  %p3820_p1 = scmp.lt.s32.totalorder %s3818_s7, %s3812_s1 }
 0x5f6   : > { %3653 = vmatprep.subr.mxu1 %v3874_v2  ;;  %3619 = vmatpush3.msra.mxu0 %v3102_v41  ;;  %v2504_v41 = vld [vmem:[%s5131_s16 + $0x8] sm:$0xff] }
 0x5f7   : > { %3654 = vmatpush3.msra.mxu1 %v2241_v42  ;;  %3620 = vmatprep.subr.mxu0 %v3874_v2  ;;  %v2503_v42 = vld [vmem:[%s5131_s16] sm:$0xff]  ;;  %p3814_p12 = pnand %p3813_p11, %p4048_p5  ;;  %p3821_p2 = por %p3820_p1, %p3819_p0 }
 0x5f8   : > { %3655 = vmatprep.subr.mxu1 %v3874_v2  ;;  %3621 = vmatpush3.msra.mxu0 %v3101_v43 }
 0x5f9   : > { %3656 = vmatpush3.msra.mxu1 %v2240_v44  ;;  %3622 = vmatprep.subr.mxu0 %v3874_v2  ;;  %p3815_p13 = pneg %p3814_p12 }
 0x5fa   : > { %3657 = vmatprep.subr.mxu1 %v3874_v2  ;;  %3623 = vmatpush3.msra.mxu0 %v3100_v45 }
 0x5fb   : > { %3658 = vmatpush3.msra.mxu1 %v2239_v46  ;;  %3624 = vmatprep.subr.mxu0 %v3874_v2  ;;  %p3822_p3 = pnand %p3821_p2, %p3815_p13 }
 0x5fc   : > { %3659 = vmatprep.subr.mxu1 %v3874_v2  ;;  %3625 = vmatpush3.msra.mxu0 %v3099_v47  ;;  %v2497_v47 = vld [vmem:[%s5130_s15] sm:$0x1] }
 0x5fd   : > { %3660 = vmatpush3.msra.mxu1 %v2238_v48  ;;  %3626 = vmatprep.subr.mxu0 %v3874_v2 }
 0x5fe   : > { %3661 = vmatprep.subr.mxu1 %v3874_v2  ;;  %3627 = vmatpush3.msra.mxu0 %v3098_v57  ;;  %v2665_v57 = vld [vmem:[%s5134_s19 + $0x8] sm:$0xff] }
 0x5ff   : > { %3628 = vmatprep.subr.mxu0 %v3874_v2  ;;  %3662 = vmatpush3.msra.mxu1 %v2237_v60 }
 0x600   : > { %3629 = vmatpush3.msra.mxu0 %v3097_v61  ;;  %3663 = vmatprep.subr.mxu1 %v3874_v2  ;;  %v2658_v61 = vld [vmem:[%s5133_s18] sm:$0x1] }
 0x601   : > { %3630 = vmatprep.subr.mxu0 %v3874_v2  ;;  %3664 = vmatpush3.msra.mxu1 %v2236_v62 }
 0x602   : > { %3631 = vmatpush3.msra.mxu0 %v3096_v0  ;;  %3665 = vmatprep.subr.mxu1 %v3874_v2 }
 0x603   : > { %3632 = vmatprep.subr.mxu0 %v3874_v2  ;;  %3666 = vmatpush3.msra.mxu1 %v2235_v3 }
 0x604   : > { %3633 = vmatpush3.msra.mxu0 %v3095_v4  ;;  %3667 = vmatprep.subr.mxu1 %v3874_v2 }
 0x605   : > { %3668 = vmatpush3.msra.mxu1 %v2234_v7  ;;  %3672 = vmatprep.subr.mxu0 %v3874_v2  ;;  %v2747_v7 = vld [vmem:[%s5136_s21 + $0x8] sm:$0xff] }
 0x606   : > { %3707 = vmatprep.subr.mxu1 %v3874_v2 }
 0x6a4   : > { %v2118_v49 = vpop.f32.mrf.mxu0 }
 0x6a5   : > { %v2195_v50 = vmul.f32 %v2118_v49, %v2118_v49  ;;  %v2200_v59 = vrot.slane %v2118_v49, %v4408_v58 }
 0x6a6   : > { %v3582_v51 = vpop.f32.mrf.mxu0  ;;  %v2191_v52 = vpop.f32.mrf.mxu1 }
 0x6a7   : > { %v2196_v53 = vsub.f32 %v2191_v52, %v2195_v50  ;;  %v2201_v5 = vsub.f32 %v4755_v8, %v2200_v59  ;;  %v2664_v59 = vld [vmem:[%s5134_s19] sm:$0xff] }
 0x6a8   : > { %v3601_v54 = vpop.f32.mrf.mxu1 }
 0x6a9   : > { %v2202_v55 = vadd.f32 1e-05, %v2196_v53 }
 0x6ab   : > { %3810 = vrsqrt.f32 %v2202_v55  ;;  %v2667_v55 = vld [vmem:[%s5134_s19 + $0x18] sm:$0xff] }
 0x6b8   : > { %v3811_v63 = vpop.eup %3810 }
 0x6b9   : > { %v2205_v1 = vmul.f32 %v3811_v63, %v2204_v56  ;;  %v2666_v56 = vld [vmem:[%s5134_s19 + $0x10] sm:$0xff] }
 0x6bb   : > { %v2209_v6 = vrot.slane %v2205_v1, %v4408_v58  ;;  %v2233_v58 = vld [vmem:[#allocation4] sm:$0x1] }
 0x6bc   : > { %3670 = vmatmul.mubr.f32.vlgmr.msra.gmra.mxu1 %v2233_v58 }
 0x6bd   : > { %v2210_v10 = vmul.f32 %v2209_v6, %v2201_v5  ;;  %3715 = vmatprep.mubr.msk.f32.mxu1 %vm3875_vm2, %v3874_v2  ;;  %3708 = vmatpush3.msra.mxu1 %v2510_v33  ;;  %v2749_v5 = vld [vmem:[%s5136_s21 + $0x18] sm:$0xff]  ;;  %v2748_v6 = vld [vmem:[%s5136_s21 + $0x10] sm:$0xff] }
 0x6be   : > { %3709 = vmatprep.subr.mxu1 %v3874_v2 }
 0x6bf   : > { %v2218_v8 = vadd.f32 %v3094_v9, %v2210_v10  ;;  %3710 = vmatpush3.msra.mxu1 %v2509_v34  ;;  %v2746_v9 = vld [vmem:[%s5136_s21] sm:$0xff] }
 0x6c0   : > { %3711 = vmatprep.subr.mxu1 %v3874_v2  ;;  %v2668_v10 = vld [vmem:[%s5135_s20] sm:$0x1] }
 0x6c1   : > { %vm2219_vm3 = vcmp.ge.f32.partialorder %v2218_v8, 0.0  ;;  %v2220_v11 = vmul.f32 0.2, %v2218_v8  ;;  %3712 = vmatpush3.msra.mxu1 %v2508_v36 }
 0x6c2   : > { %3713 = vmatprep.subr.mxu1 %v3874_v2 }
 0x6c3   : > { %v2221_v12 = vsel %vm2219_vm3, %v2218_v8, %v2220_v11  ;;  %3714 = vmatpush3.msra.mxu1 %v2507_v37 }
 0x6c4   : > { %2225 = vrot.lane.b32.xlu1 %v2221_v12, %s3878_s28  ;;  %3716 = vmatmul.mubr.msk.f32.vlgmr.msra.gmra.mxu1 %vm2511_vm12, %v2502_v38 }
 0x6c5   : > { %3718 = vmatprep.subr.mxu1 %v3874_v2  ;;  %3726 = vmatprep.mubr.msk.f32.mxu1 %vm3875_vm2, %v3874_v2 }
 0x6c6   : > { %3719 = vmatpush3.msra.mxu1 %v2506_v39 }
 0x6c7   : > { %3720 = vmatprep.subr.mxu1 %v3874_v2 }
 0x6c8   : > { %3721 = vmatpush3.msra.mxu1 %v2505_v40 }
 0x6c9   : > { %3722 = vmatprep.subr.mxu1 %v3874_v2 }
 0x6ca   : > { %3723 = vmatpush3.msra.mxu1 %v2504_v41 }
 0x6cb   : > { %3724 = vmatprep.subr.mxu1 %v3874_v2 }
 0x6cc   : > { %3725 = vmatpush3.msra.mxu1 %v2503_v42 }
 0x6cd   : > { %3729 = vmatprep.subr.mxu1 %v3874_v2 }
 0x736   : > { %v2226_v13 = vpop.permute.xlu1 %2225 }
 0x737   : > { %2230 = vst.msk [vmem:[#allocation4 + $0x2] sm:$0x1] %vm2229_vm10, %v2226_v13 }
 0x738   : > { %2232 = vst.msk [vmem:[#allocation4] sm:$0x2] %vm2231_vm11, %v2226_v13 }
 0x73e   : > { %v2250_v15 = vld [vmem:[#allocation4 + $0x2] sm:$0x1] }
 0x73f   : > { %3635 = vmatmul.mubr.f32.vlgmr.msra.gmra.mxu0 %v2250_v15  ;;  %v2408_v31 = vld [vmem:[#allocation4 + $0x1] sm:$0x1] }
 0x740   : > { %3673 = vmatpush3.msra.mxu0 %v3126_v14  ;;  %3704 = vmatprep.mubr.msk.f32.mxu0 %vm3875_vm2, %v3874_v2  ;;  %v2831_v15 = vld [vmem:[%s5138_s23 + $0x18] sm:$0xff] }
 0x741   : > { %3674 = vmatprep.subr.mxu0 %v3874_v2 }
 0x742   : > { %3675 = vmatpush3.msra.mxu0 %v3125_v16  ;;  %v2830_v16 = vld [vmem:[%s5138_s23 + $0x10] sm:$0xff] }
 0x743   : > { %3676 = vmatprep.subr.mxu0 %v3874_v2 }
 0x744   : > { %3677 = vmatpush3.msra.mxu0 %v3124_v17  ;;  %v2829_v17 = vld [vmem:[%s5138_s23 + $0x8] sm:$0xff] }
 0x745   : > { %3678 = vmatprep.subr.mxu0 %v3874_v2 }
 0x746   : > { %3679 = vmatpush3.msra.mxu0 %v3123_v18  ;;  %v2828_v18 = vld [vmem:[%s5138_s23] sm:$0xff] }
 0x747   : > { %3680 = vmatprep.subr.mxu0 %v3874_v2 }
 0x748   : > { %3681 = vmatpush3.msra.mxu0 %v3122_v19  ;;  %v2750_v19 = vld [vmem:[%s5137_s22] sm:$0x1] }
 0x749   : > { %3682 = vmatprep.subr.mxu0 %v3874_v2 }
 0x74a   : > { %3683 = vmatpush3.msra.mxu0 %v3121_v20 }
 0x74b   : > { %3684 = vmatprep.subr.mxu0 %v3874_v2 }
 0x74c   : > { %3685 = vmatpush3.msra.mxu0 %v3120_v21 }
 0x74d   : > { %3686 = vmatprep.subr.mxu0 %v3874_v2 }
 0x74e   : > { %3687 = vmatpush3.msra.mxu0 %v3119_v22 }
 0x74f   : > { %3688 = vmatprep.subr.mxu0 %v3874_v2 }
 0x750   : > { %3689 = vmatpush3.msra.mxu0 %v3118_v23 }
 0x751   : > { %3690 = vmatprep.subr.mxu0 %v3874_v2 }
 0x752   : > { %3691 = vmatpush3.msra.mxu0 %v3117_v24 }
 0x753   : > { %3692 = vmatprep.subr.mxu0 %v3874_v2 }
 0x754   : > { %3693 = vmatpush3.msra.mxu0 %v3116_v25 }
 0x755   : > { %3694 = vmatprep.subr.mxu0 %v3874_v2 }
 0x756   : > { %3695 = vmatpush3.msra.mxu0 %v3115_v26 }
 0x757   : > { %3696 = vmatprep.subr.mxu0 %v3874_v2 }
 0x758   : > { %3697 = vmatpush3.msra.mxu0 %v3114_v27 }
 0x759   : > { %3698 = vmatprep.subr.mxu0 %v3874_v2 }
 0x75a   : > { %3699 = vmatpush3.msra.mxu0 %v3113_v28 }
 0x75b   : > { %3700 = vmatprep.subr.mxu0 %v3874_v2 }
 0x75c   : > { %3701 = vmatpush3.msra.mxu0 %v3112_v29 }
 0x75d   : > { %3702 = vmatprep.subr.mxu0 %v3874_v2 }
 0x75e   : > { %3703 = vmatpush3.msra.mxu0 %v3111_v30 }
 0x75f   : > { %3705 = vmatmul.mubr.f32.vlgmr.msra.gmra.mxu0 %v2408_v31  ;;  %3740 = vmatprep.subr.mxu0 %v3874_v2 }
 0x760   : > { %3748 = vmatprep.mubr.msk.f32.mxu0 %vm3875_vm2, %v3874_v2  ;;  %3741 = vmatpush3.msra.mxu0 %v2749_v5 }
 0x761   : > { %3742 = vmatprep.subr.mxu0 %v3874_v2 }
 0x762   : > { %3743 = vmatpush3.msra.mxu0 %v2748_v6 }
 0x763   : > { %3744 = vmatprep.subr.mxu0 %v3874_v2 }
 0x764   : > { %3745 = vmatpush3.msra.mxu0 %v2747_v7 }
 0x765   : > { %3746 = vmatprep.subr.mxu0 %v3874_v2 }
 0x766   : > { %3747 = vmatpush3.msra.mxu0 %v2746_v9 }
 0x77c   : > { %v2404_v32 = vpop.f32.mrf.mxu1 }
 0x77e   : > { %v3671_v35 = vpop.f32.mrf.mxu1 }
 0x784   : > { %v2581_v53 = vpop.f32.mrf.mxu1 }
 0x786   : > { %v3717_v54 = vpop.f32.mrf.mxu1 }
 0x7ff   : > { %v2334_v43 = vpop.f32.mrf.mxu0 }
 0x800   : > { %v2405_v45 = vadd.f32 %v2404_v32, %v2334_v43 }
 0x801   : > { %v3636_v44 = vpop.f32.mrf.mxu0 }
 0x81f   : > { %v2492_v46 = vpop.f32.mrf.mxu0 }
 0x820   : > { %v2496_v48 = vadd.f32 %v2492_v46, %v2405_v45 }
 0x821   : > { %v3706_v49 = vpop.f32.mrf.mxu0 }
 0x822   : > { %v2498_v50 = vadd.f32 %v2497_v47, %v2496_v48 }
 0x824   : > { %vm2499_vm13 = vcmp.ge.f32.partialorder %v2498_v50, 0.0  ;;  %v2500_v51 = vmul.f32 0.2, %v2498_v50 }
 0x826   : > { %v2501_v52 = vsel %vm2499_vm13, %v2498_v50, %v2500_v51 }
 0x827   : > { %3727 = vmatmul.mubr.msk.f32.vlgmr.msra.gmra.mxu1 %vm2511_vm12, %v2501_v52 }
 0x828   : > { %3737 = vmatprep.mubr.msk.f32.mxu1 %vm3875_vm2, %v3874_v2  ;;  %3730 = vmatpush3.msra.mxu1 %v2667_v55 }
 0x829   : > { %3731 = vmatprep.subr.mxu1 %v3874_v2 }
 0x82a   : > { %3732 = vmatpush3.msra.mxu1 %v2666_v56 }
 0x82b   : > { %3733 = vmatprep.subr.mxu1 %v3874_v2 }
 0x82c   : > { %3734 = vmatpush3.msra.mxu1 %v2665_v57 }
 0x82d   : > { %3735 = vmatprep.subr.mxu1 %v3874_v2 }
 0x82e   : > { %3736 = vmatpush3.msra.mxu1 %v2664_v59 }
 0x82f   : > { %3751 = vmatprep.subr.mxu1 %v3874_v2 }
 0x8e7   : > { %v2654_v60 = vpop.f32.mrf.mxu1 }
 0x8e8   : > { %v2655_v62 = vadd.f32 %v2654_v60, %v2581_v53 }
 0x8e9   : > { %v3728_v63 = vpop.f32.mrf.mxu1 }
 0x8ea   : > { %v2659_v0 = vadd.f32 %v2658_v61, %v2655_v62 }
 0x8ec   : > { %vm2660_vm14 = vcmp.ge.f32.partialorder %v2659_v0, 0.0  ;;  %v2661_v1 = vmul.f32 0.2, %v2659_v0 }
 0x8ee   : > { %v2662_v3 = vsel %vm2660_vm14, %v2659_v0, %v2661_v1 }
 0x8ef   : > { %v2663_v4 = vmul.f32 1.4142135, %v2662_v3 }
 0x8f1   : > { %3738 = vmatmul.mubr.msk.f32.vlgmr.msra.gmra.mxu1 %vm2511_vm12, %v2663_v4 }
 0x8f2   : > { %3759 = vmatprep.mubr.msk.f32.mxu1 %vm3875_vm2, %v3874_v2  ;;  %3752 = vmatpush3.msra.mxu1 %v2831_v15 }
 0x8f3   : > { %3753 = vmatprep.subr.mxu1 %v3874_v2 }
 0x8f4   : > { %3754 = vmatpush3.msra.mxu1 %v2830_v16 }
 0x8f5   : > { %3755 = vmatprep.subr.mxu1 %v3874_v2 }
 0x8f6   : > { %3756 = vmatpush3.msra.mxu1 %v2829_v17 }
 0x8f7   : > { %3757 = vmatprep.subr.mxu1 %v3874_v2  ;;  %v2832_v2 = vld [vmem:[%s5139_s24] sm:$0x1] }
 0x8f8   : > { %3758 = vmatpush3.msra.mxu1 %v2828_v18 }
 0x9b1   : > { %v2738_v58 = vpop.f32.mrf.mxu1 }
 0x9b2   : > { %v2739_v8 = vadd.f32 %v2738_v58, %v2668_v10 }
 0x9b3   : > { %v3739_v11 = vpop.f32.mrf.mxu1 }
 0x9b4   : > { %vm2742_vm2 = vcmp.ge.f32.partialorder %v2739_v8, 0.0  ;;  %v2743_v12 = vmul.f32 0.2, %v2739_v8 }
 0x9b6   : > { %v2744_v13 = vsel %vm2742_vm2, %v2739_v8, %v2743_v12 }
 0x9b7   : > { %v2745_v14 = vmul.f32 1.4142135, %v2744_v13 }
 0x9b9   : > { %3749 = vmatmul.mubr.msk.f32.vlgmr.msra.gmra.mxu0 %vm2511_vm12, %v2745_v14 }
 0xa79   : > { %v2820_v20 = vpop.f32.mrf.mxu0 }
 0xa7a   : > { %v2821_v21 = vadd.f32 %v2820_v20, %v2750_v19 }
 0xa7b   : > { %v3750_v22 = vpop.f32.mrf.mxu0 }
 0xa7c   : > { %vm2824_vm15 = vcmp.ge.f32.partialorder %v2821_v21, 0.0  ;;  %v2825_v23 = vmul.f32 0.2, %v2821_v21 }
 0xa7e   : > { %v2826_v24 = vsel %vm2824_vm15, %v2821_v21, %v2825_v23 }
 0xa7f   : > { %v2827_v25 = vmul.f32 1.4142135, %v2826_v24 }
 0xa81   : > { %3760 = vmatmul.mubr.msk.f32.vlgmr.msra.gmra.mxu1 %vm2511_vm12, %v2827_v25 }
 0xb41   : > { %v2902_v26 = vpop.f32.mrf.mxu1 }
 0xb42   : > { %v2903_v27 = vadd.f32 %v2902_v26, %v2832_v2 }
 0xb43   : > { %v3761_v28 = vpop.f32.mrf.mxu1 }
 0xb44   : > { %vm2906_vm0 = vcmp.ge.f32.partialorder %v2903_v27, 0.0  ;;  %v2907_v29 = vmul.f32 0.2, %v2903_v27 }
 0xb46   : > { %v2908_v30 = vsel %vm2906_vm0, %v2903_v27, %v2907_v29 }
 0xb47   : > { %v2909_v31 = vmul.f32 1.4142135, %v2908_v30 }
 0xb49   : > { %2911 = vst.msk [vmem:[%s767_s0] sm:$0x1] %vm2910_vm1, %v2909_v31 }
 0xb4a   : > { %3825 = shalt.err (!%p3822_p3)
}
 0xb4b   : > { %s3826_s10 = scalar_lea.hbm %s2923_s27, 16  ;;  %s3830_s0 = scalar_lea.hbm %s5186_s26, 32 }
 0xb4c   : > { %p3827_p4 = scmp.ne.s32.totalorder %s2923_s27, %s3826_s10  ;;  %p3831_p9 = scmp.lt.s32.totalorder %s2923_s27, %s5186_s26 }
 0xb4d   : > { %p3832_p10 = scmp.lt.s32.totalorder %s3830_s0, %s3826_s10 }
 0xb4e   : > { %p3828_p7 = pnand %p3827_p4, %p4048_p5 }
 0xb4f   : > { %p3833_p11 = por %p3832_p10, %p3831_p9 }
 0xb50   : > { %p3829_p8 = pneg %p3828_p7 }
 0xb52   : > { %p3834_p12 = pnand %p3833_p11, %p3829_p8 }
 0xb54   : > { %3837 = shalt.err (!%p3834_p12)
}
 0xb55   : > { %3762 = dma.vmem_to_hbm [thread:$0]  (%p4048_p5), %s2926_s5, 16, %s2923_s27, %s2913_s30  }
 0xb56 PF: > { %s5187_s1 = sld [smem:[#allocation10_spill]] }
 0xb57   : > { %s5188_s8 = sld [smem:[#allocation8_spill]] }
 0xb5c   : > { %p3768_p13 = scmp.ge.s32.totalorder %s5187_s1, 2 }
 0xb5d   : > { %s2937_s7 = sand.u32 1, %s5188_s8  }
 0xb5e   : > { %p3765_p0 = pnand %p3768_p13, %p4052_p6  ;;  %s2938_s9 = scalar_lea.sflag [#allocation6], %s2937_s7 }
 0xb60   : > { %p3766_p1 = pneg %p3765_p0 }
 0xb62   : > { %3855 = dma.done.wait (%p3766_p1), %s2938_s9, 16  }
 0xb63   : > { %3857 = vsyncadd (%p3766_p1), %s2938_s9, 4294967280  ;;  %s5190_s30 = sld [smem:[#allocation11_spill]]  ;;  %s5193_s29 = smov %s3864_s2 }
 0xb64   : > { %s5191_s10 = sld [smem:[#allocation9_spill]] }
 0xb65   : > { %s5192_s6 = sld [smem:[#allocation12_spill]] }
 0xb69   : > { %p35_p2 = scmp.ge.s32.totalorder %s5190_s30, 4  }
 0xb6a   : > { %s5194_s2 = smov %s5191_s10 }
 0xb6b   :  { %37 = sbr.rel (!%p35_p2) target bundleno = 16 (0x10), region = 170 }
 0xb70   :  { %2942 = vsyncpa [#allocation6], 1 }
 0xb71   :  { %2944 = vsyncpa [#allocation6 + $0x1], 1 }

</bundles_post_ra>
